<compile_context>
chip_gen: v5e
topology: v5e:2x2
jax: 0.10.0
libtpu: 0.0.40
codegen_flags: <defaults>
</compile_context>

<pallas_src>
import jax
import jax.numpy as jnp
from jax.experimental import pallas as pl
from jax.experimental.pallas import tpu as pltpu


def _round_up(n, m):
    return ((n + m - 1) // m) * m


def mlp_kernel(x_ref, w1_ref, b1_ref, w2_ref, b2_ref, o_ref):
    # fc1: bf16 x bf16 -> f32 accumulate on the MXU.
    h = jnp.dot(x_ref[...], w1_ref[...], preferred_element_type=jnp.float32)
    # bias + ReLU in f32 on the VPU ((1, H) broadcasts over the batch tile).
    h = jnp.maximum(h + b1_ref[...], 0.0)
    # fc2: cast activation back to bf16 for the MXU, accumulate in f32.
    y = jnp.dot(h.astype(w2_ref.dtype), w2_ref[...],
                preferred_element_type=jnp.float32)
    o_ref[...] = (y + b2_ref[...]).astype(o_ref.dtype)


def prepare_params(w1, b1, w2, b2):
    """One-time padding + bf16 cast of the weights.

    Hoisted out of the per-call forward so repeated inference reuses the
    padded buffers (the dominant per-call HBM cost in the old version).

    w1: (in_size, hidden)  == PyTorch fc1.weight.T
    b1: (hidden,)
    w2: (hidden, classes)  == PyTorch fc2.weight.T
    b2: (classes,)
    """
    in_size, hidden = w1.shape
    num_classes = w2.shape[1]
    in_pad = _round_up(in_size, 128)        # 784 -> 896
    hid_pad = _round_up(hidden, 128)        # 500 -> 512
    cls_pad = _round_up(num_classes, 128)   # 10  -> 128 (lane-dense output)

    w1p = jnp.zeros((in_pad, hid_pad), jnp.bfloat16)
    w1p = w1p.at[:in_size, :hidden].set(w1.astype(jnp.bfloat16))
    b1p = jnp.zeros((1, hid_pad), jnp.float32)
    b1p = b1p.at[:, :hidden].set(b1.reshape(1, -1).astype(jnp.float32))
    w2p = jnp.zeros((hid_pad, cls_pad), jnp.bfloat16)
    w2p = w2p.at[:hidden, :num_classes].set(w2.astype(jnp.bfloat16))
    b2p = jnp.zeros((1, cls_pad), jnp.float32)
    b2p = b2p.at[:, :num_classes].set(b2.reshape(1, -1).astype(jnp.float32))

    dims = (in_size, hidden, num_classes)
    return (w1p, b1p, w2p, b2p), dims


def _choose_batch_tiling(B, tm=None):
    """Pick (tm, padded_batch). bf16 sublane tile height is 16, so tiny
    batches only pad to 16.  Medium batches use 256-row tiles (full MXU
    height on v6e/v7x, >=2 grid steps for v7x dual-TC); large use 512."""
    b16 = _round_up(max(B, 1), 16)
    if tm is not None:
        tm = max(16, _round_up(tm, 16))
        return tm, _round_up(b16, tm)
    if b16 <= 256:
        return b16, b16
    if b16 <= 1024:
        return 256, _round_up(B, 256)
    return 512, _round_up(B, 512)


def network_forward(x, padded_params, dims, *, tm=None):
    """Forward pass of Network.  x: (B, in_size) f32 -> (B, num_classes) f32."""
    w1p, b1p, w2p, b2p = padded_params
    in_size, hidden, num_classes = dims
    B = x.shape[0]
    in_pad, hid_pad = w1p.shape
    cls_pad = w2p.shape[1]

    tm, b_pad = _choose_batch_tiling(B, tm)

    # Per-call activation padding + bf16 cast.  Exact: padded input lanes are
    # zero and the matching (padded) weight rows are zero too.
    xp = jnp.zeros((b_pad, in_pad), jnp.bfloat16)
    xp = xp.at[:B, :in_size].set(x.astype(jnp.bfloat16))

    grid = (b_pad // tm,)

    out = pl.pallas_call(
        mlp_kernel,
        out_shape=jax.ShapeDtypeStruct((b_pad, cls_pad), jnp.float32),
        grid=grid,
        in_specs=[
            # Activation tiles march along the batch grid (double-buffered).
            pl.BlockSpec((tm, in_pad), lambda i: (i, 0)),
            # Weights / biases: constant block index -> DMA'd once, resident.
            pl.BlockSpec((in_pad, hid_pad), lambda i: (0, 0)),
            pl.BlockSpec((1, hid_pad), lambda i: (0, 0)),
            pl.BlockSpec((hid_pad, cls_pad), lambda i: (0, 0)),
            pl.BlockSpec((1, cls_pad), lambda i: (0, 0)),
        ],
        out_specs=pl.BlockSpec((tm, cls_pad), lambda i: (i, 0)),
        compiler_params=pltpu.CompilerParams(
            dimension_semantics=("parallel",),
            vmem_limit_bytes=32 * 1024 * 1024,
        ),
    )(xp, w1p, b1p, w2p, b2p)

    return out[:B, :num_classes]


def init_params(key, in_size=784, hidden_size=500, num_classes=10):
    """Deterministic init mirroring nn.Linear's U(-1/sqrt(fan_in), 1/sqrt(fan_in))."""
    k1, k2, k3, k4 = jax.random.split(key, 4)
    bound1 = 1.0 / jnp.sqrt(in_size)
    bound2 = 1.0 / jnp.sqrt(hidden_size)
    # Stored as (in, out) == PyTorch weight.T so the kernel computes x @ W.
    w1 = jax.random.uniform(k1, (in_size, hidden_size), jnp.float32, -bound1, bound1)
    b1 = jax.random.uniform(k2, (hidden_size,), jnp.float32, -bound1, bound1)
    w2 = jax.random.uniform(k3, (hidden_size, num_classes), jnp.float32, -bound2, bound2)
    b2 = jax.random.uniform(k4, (num_classes,), jnp.float32, -bound2, bound2)
    return w1, b1, w2, b2


if __name__ == "__main__":
    key = jax.random.PRNGKey(0)
    kx, kp = jax.random.split(key)

    batch, in_size, hidden_size, num_classes = 8, 784, 500, 10
    x = jax.random.normal(kx, (batch, in_size), jnp.float32)
    w1, b1, w2, b2 = init_params(kp, in_size, hidden_size, num_classes)

    # One-time weight padding / bf16 cast (hoisted out of the per-call path).
    padded_params, dims = prepare_params(w1, b1, w2, b2)

    out = network_forward(x, padded_params, dims)
    out = jax.block_until_ready(out)
    assert out.shape == (batch, num_classes)

    # Reference 1: emulate the kernel's bf16-operand / f32-accumulate math.
    xb, w1b, w2b = (a.astype(jnp.bfloat16) for a in (x, w1, w2))
    h_ref = jnp.maximum(
        jnp.dot(xb, w1b, preferred_element_type=jnp.float32) + b1[None, :], 0.0)
    ref_bf16 = jnp.dot(h_ref.astype(jnp.bfloat16), w2b,
                       preferred_element_type=jnp.float32) + b2[None, :]
    assert jnp.allclose(out, ref_bf16, atol=2e-2, rtol=2e-2)

    # Reference 2: full-f32 PyTorch-equivalent forward (looser tolerance:
    # bf16 operands introduce quantization vs f32-exact parity).
    ref_f32 = jnp.maximum(x @ w1 + b1[None, :], 0.0) @ w2 + b2[None, :]
    assert jnp.allclose(out, ref_f32, atol=5e-2, rtol=5e-2)

    print("KERNEL_OK")
</pallas_src>

<mosaic_0001>
module attributes {stable_mosaic.version = 11 : i64} {
  func.func @mlp_kernel(%arg0: i32, %arg1: memref<16x896xbf16, #tpu.memory_space<vmem>>, %arg2: memref<896x512xbf16, #tpu.memory_space<vmem>>, %arg3: memref<1x512xf32, #tpu.memory_space<vmem>>, %arg4: memref<512x128xbf16, #tpu.memory_space<vmem>>, %arg5: memref<1x128xf32, #tpu.memory_space<vmem>>, %arg6: memref<16x128xf32, #tpu.memory_space<vmem>>) attributes {dimension_semantics = [#tpu.dimension_semantics<parallel>], iteration_bounds = array<i64: 1>, scalar_prefetch = 0 : i64, scratch_operands = 0 : i64, tpu.core_type = #tpu.core_type<tc>, window_params = [{transform_indices = @transform_0, window_bounds = array<i64: 16, 896>}, {pipeline_mode = #tpu.pipeline_mode<synchronous>, transform_indices = @transform_1, window_bounds = array<i64: 896, 512>}, {pipeline_mode = #tpu.pipeline_mode<synchronous>, transform_indices = @transform_2, window_bounds = array<i64: 1, 512>}, {pipeline_mode = #tpu.pipeline_mode<synchronous>, transform_indices = @transform_3, window_bounds = array<i64: 512, 128>}, {pipeline_mode = #tpu.pipeline_mode<synchronous>, transform_indices = @transform_4, window_bounds = array<i64: 1, 128>}, {transform_indices = @transform_5, window_bounds = array<i64: 16, 128>}]} {
    %c0 = arith.constant 0 : index
    %c0_0 = arith.constant 0 : index
    %0 = vector.load %arg1[%c0, %c0_0] : memref<16x896xbf16, #tpu.memory_space<vmem>>, vector<16x896xbf16>
    %c0_1 = arith.constant 0 : index
    %c0_2 = arith.constant 0 : index
    %1 = vector.load %arg2[%c0_1, %c0_2] : memref<896x512xbf16, #tpu.memory_space<vmem>>, vector<896x512xbf16>
    %cst = arith.constant dense<0.000000e+00> : vector<16x512xf32>
    %2 = tpu.matmul %0, %1, %cst {dimension_numbers = #tpu.dot_dimension_numbers<[1], [0], [0], [1], [0, 0, 1, 1], [], []>} : vector<16x896xbf16>, vector<896x512xbf16>, vector<16x512xf32> -> vector<16x512xf32>
    %c0_3 = arith.constant 0 : index
    %c0_4 = arith.constant 0 : index
    %3 = vector.load %arg3[%c0_3, %c0_4] : memref<1x512xf32, #tpu.memory_space<vmem>>, vector<1x512xf32>
    %4 = vector.broadcast %3 : vector<1x512xf32> to vector<16x512xf32>
    %5 = arith.addf %2, %4 : vector<16x512xf32>
    %cst_5 = arith.constant 0.000000e+00 : f32
    %6 = vector.broadcast %cst_5 : f32 to vector<16x512xf32>
    %7 = arith.maximumf %5, %6 : vector<16x512xf32>
    %8 = arith.truncf %7 : vector<16x512xf32> to vector<16x512xbf16>
    %c0_6 = arith.constant 0 : index
    %c0_7 = arith.constant 0 : index
    %9 = vector.load %arg4[%c0_6, %c0_7] : memref<512x128xbf16, #tpu.memory_space<vmem>>, vector<512x128xbf16>
    %cst_8 = arith.constant dense<0.000000e+00> : vector<16x128xf32>
    %10 = tpu.matmul %8, %9, %cst_8 {dimension_numbers = #tpu.dot_dimension_numbers<[1], [0], [0], [1], [0, 0, 1, 1], [], []>} : vector<16x512xbf16>, vector<512x128xbf16>, vector<16x128xf32> -> vector<16x128xf32>
    %c0_9 = arith.constant 0 : index
    %c0_10 = arith.constant 0 : index
    %11 = vector.load %arg5[%c0_9, %c0_10] : memref<1x128xf32, #tpu.memory_space<vmem>>, vector<1x128xf32>
    %12 = vector.broadcast %11 : vector<1x128xf32> to vector<16x128xf32>
    %13 = arith.addf %10, %12 : vector<16x128xf32>
    %c0_11 = arith.constant 0 : index
    %c0_12 = arith.constant 0 : index
    %14 = vector.load %arg6[%c0_11, %c0_12] : memref<16x128xf32, #tpu.memory_space<vmem>>, vector<16x128xf32>
    tpu.vector_store %arg6[%c0_11, %c0_12], %13 {strides = array<i32>} : memref<16x128xf32, #tpu.memory_space<vmem>>, vector<16x128xf32>,
    return
  }
  func.func @transform_0(%arg0: i32) -> (i32, i32) {
    %c0_i32 = arith.constant 0 : i32
    %c0_i32_0 = arith.constant 0 : i32
    return %arg0, %c0_i32 : i32, i32
  }
  func.func @transform_1(%arg0: i32) -> (i32, i32) {
    %c0_i32 = arith.constant 0 : i32
    %c0_i32_0 = arith.constant 0 : i32
    %c0_i32_1 = arith.constant 0 : i32
    return %c0_i32, %c0_i32_0 : i32, i32
  }
  func.func @transform_2(%arg0: i32) -> (i32, i32) {
    %c0_i32 = arith.constant 0 : i32
    %c0_i32_0 = arith.constant 0 : i32
    %c0_i32_1 = arith.constant 0 : i32
    return %c0_i32, %c0_i32_0 : i32, i32
  }
  func.func @transform_3(%arg0: i32) -> (i32, i32) {
    %c0_i32 = arith.constant 0 : i32
    %c0_i32_0 = arith.constant 0 : i32
    %c0_i32_1 = arith.constant 0 : i32
    return %c0_i32, %c0_i32_0 : i32, i32
  }
  func.func @transform_4(%arg0: i32) -> (i32, i32) {
    %c0_i32 = arith.constant 0 : i32
    %c0_i32_0 = arith.constant 0 : i32
    %c0_i32_1 = arith.constant 0 : i32
    return %c0_i32, %c0_i32_0 : i32, i32
  }
  func.func @transform_5(%arg0: i32) -> (i32, i32) {
    %c0_i32 = arith.constant 0 : i32
    %c0_i32_0 = arith.constant 0 : i32
    return %arg0, %c0_i32 : i32, i32
  }
}

</mosaic_0001>

<bundles_post_ra>
// kernel: tpu_custom_call.1
= control target key start
LH: loop header
LB: loop body
LE: loop exit
PB: predicated region body
PF: predicated region fallthrough
CT: control target
= control target key end

     0   :  { %10 = vsyncpa [#allocation3], 0  ;;  %s3798_s0 = inlined_call_operand.hbm [shape: bf16[16,896], index: 0, kind: input, shape index: {}]   ;;  %s3799_s1 = inlined_call_operand.hbm [shape: bf16[896,512], index: 1, kind: input, shape index: {}]   ;;  %s3800_s2 = inlined_call_operand.hbm [shape: f32[1,512], index: 2, kind: input, shape index: {}]   ;;  %s3801_s3 = inlined_call_operand.hbm [shape: bf16[512,128], index: 3, kind: input, shape index: {}]   ;;  %s3802_s4 = inlined_call_operand.vmem [shape: f32[1,128], index: 4, kind: input, shape index: {}]   ;;  %s3803_s5 = inlined_call_operand.hbm [shape: f32[16,128], index: 5, kind: output, shape index: {}]  }
   0x1   :  { %11 = vsyncpa [#allocation6], 0 }
   0x2   :  { %12 = vsyncpa [#allocation9], 0  ;;  %s31_s20 = sshll.u32 %s3799_s1, 4  ;;  %s32_s20 = int_to_ptr.hbm [resolvable:$true] %s31_s20 }
   0x3   :  { %13 = vsyncpa [#allocation4], 0  ;;  %s3680_s21 = smov [#allocation5]   ;;  %s18_s25 = sshll.u32 %s3798_s0, 4  ;;  %s19_s25 = int_to_ptr.hbm [resolvable:$true] %s18_s25 }
   0x4   :  { %s33_s22 = sshll.u32 %s3680_s21, 4  ;;  %s3681_s26 = smov 256   ;;  %s34_s22 = int_to_ptr.vmem [resolvable:$true] %s33_s22 }
   0x5   :  { %s3682_s27 = smov 16   ;;  %s3683_s28 = smov [#allocation2]  }
   0x6   :  { %39 = dma.hbm_to_vmem [thread:$0]  %s32_s20, 28672, %s34_s22, [#allocation6], %s3681_s26, %s3681_s26, %s3682_s27  }
   0x7   :  { %s20_s29 = sshll.u32 %s3683_s28, 4  ;;  %s3684_s30 = smov 448   ;;  %s21_s29 = int_to_ptr.vmem [resolvable:$true] %s20_s29 }
   0x8   :  { %s3685_s6 = smov 28   ;;  %s45_s8 = sshll.u32 %s3800_s2, 4  ;;  %s46_s8 = int_to_ptr.hbm [resolvable:$true] %s45_s8 }
   0x9   :  { %26 = dma.hbm_to_vmem [thread:$0]  %s19_s25, 896, %s21_s29, [#allocation3], %s3684_s30, %s3684_s30, %s3685_s6  }
   0xa   :  { %s3686_s9 = smov [#allocation7]   ;;  %s55_s12 = sshll.u32 %s3801_s3, 4  ;;  %s56_s12 = int_to_ptr.hbm [resolvable:$true] %s55_s12 }
   0xb   :  { %s47_s10 = sshll.u32 %s3686_s9, 4  ;;  %s3687_s13 = smov [#allocation8]   ;;  %s48_s10 = int_to_ptr.vmem [resolvable:$true] %s47_s10 }
   0xc   :  { %50 = dma.hbm_to_vmem [thread:$0]  %s46_s8, 64, %s48_s10, [#allocation6]  }
   0xd   :  { %s57_s14 = sshll.u32 %s3687_s13, 4  ;;  %s3688_s15 = smov 64   ;;  %s58_s14 = int_to_ptr.vmem [resolvable:$true] %s57_s14 }
   0xe   :  { %s3689_s16 = smov 4  }
   0xf   :  { %63 = dma.hbm_to_vmem [thread:$0]  %s56_s12, 4096, %s58_s14, [#allocation9], %s3688_s15, %s3688_s15, %s3689_s16  }
  0x10   :  { %3672 = dma.done.wait [#allocation3], 896  }
  0x11   :  { %3673 = vsyncadd [#allocation3], 4294966400 }
  0x12   :  { %3674 = dma.done.wait [#allocation6], 28736  }
  0x13   :  { %3675 = vsyncadd [#allocation6], 4294938560 }
  0x14   :  { %3676 = dma.done.wait [#allocation9], 4096  }
  0x15   :  { %3677 = vsyncadd [#allocation9], 4294963200  ;;  %v2365_v0 = vld [vmem:[#allocation5 + $0xe0] sm:$0xf]  ;;  %v3312_v1 = vld [vmem:[#allocation5 + $0xec] sm:$0xf0] }
  0x16   :  { %v2493_v2 = vld [vmem:[#allocation5 + $0x1e0] sm:$0xf]  ;;  %v2366_v3 = vor.u32 %v3312_v1, %v2365_v0  ;;  %v3344_v4 = vld [vmem:[#allocation5 + $0x1ec] sm:$0xf0]  ;;  %s3690_s17 = smov [#allocation10]   ;;  %s2208_s21 = sshll.u32 %s3803_s5, 4  ;;  %s2209_s21 = int_to_ptr.hbm [resolvable:$true] %s2208_s21 }
  0x17   :  { %v2621_v5 = vld [vmem:[#allocation5 + $0x2e0] sm:$0xf]  ;;  %v3376_v6 = vld [vmem:[#allocation5 + $0x2ec] sm:$0xf0]  ;;  %v2494_v7 = vor.u32 %v3344_v4, %v2493_v2  ;;  %s2206_s18 = sshll.u32 %s3690_s17, 4  ;;  %s3692_s22 = smov 8   ;;  %s2207_s18 = int_to_ptr.vmem [resolvable:$true] %s2206_s18 }
  0x18   :  { %v2622_v8 = vor.u32 %v3376_v6, %v2621_v5  ;;  %v2749_v9 = vld [vmem:[#allocation5 + $0x3e0] sm:$0xf]  ;;  %v3408_v10 = vld [vmem:[#allocation5 + $0x3ec] sm:$0xf0]  ;;  %1480 = vmatpush.bf16.msra.mxu0 %v2366_v3 }
  0x19   :  { %v2349_v11 = vld [vmem:[#allocation5 + $0xc0] sm:$0xf]  ;;  %v2750_v12 = vor.u32 %v3408_v10, %v2749_v9  ;;  %v3308_v13 = vld [vmem:[#allocation5 + $0xcc] sm:$0xf0]  ;;  %1494 = vmatpush.bf16.msra.mxu1 %v2494_v7 }
  0x1a   :  { %v2477_v14 = vld [vmem:[#allocation5 + $0x1c0] sm:$0xf]  ;;  %v3340_v15 = vld [vmem:[#allocation5 + $0x1cc] sm:$0xf0]  ;;  %1508 = vmatpush.bf16.msra.mxu2 %v2622_v8  ;;  %v2350_v16 = vor.u32 %v3308_v13, %v2349_v11 }
  0x1b   :  { %v2478_v17 = vor.u32 %v3340_v15, %v2477_v14  ;;  %v2605_v18 = vld [vmem:[#allocation5 + $0x2c0] sm:$0xf]  ;;  %v3372_v19 = vld [vmem:[#allocation5 + $0x2cc] sm:$0xf0]  ;;  %1522 = vmatpush.bf16.msra.mxu3 %v2750_v12 }
  0x1c   :  { %v2733_v20 = vld [vmem:[#allocation5 + $0x3c0] sm:$0xf]  ;;  %v2606_v21 = vor.u32 %v3372_v19, %v2605_v18  ;;  %v3404_v22 = vld [vmem:[#allocation5 + $0x3cc] sm:$0xf0]  ;;  %1481 = vmatpush.bf16.msra.mxu0 %v2350_v16 }
  0x1d   :  { %v2333_v23 = vld [vmem:[#allocation5 + $0xa0] sm:$0xf]  ;;  %v3304_v24 = vld [vmem:[#allocation5 + $0xac] sm:$0xf0]  ;;  %v2734_v25 = vor.u32 %v3404_v22, %v2733_v20  ;;  %1495 = vmatpush.bf16.msra.mxu1 %v2478_v17 }
  0x1e   :  { %v2461_v26 = vld [vmem:[#allocation5 + $0x1a0] sm:$0xf]  ;;  %v3336_v27 = vld [vmem:[#allocation5 + $0x1ac] sm:$0xf0]  ;;  %v2334_v29 = vor.u32 %v3304_v24, %v2333_v23  ;;  %1509 = vmatpush.bf16.msra.mxu2 %v2606_v21 }
  0x1f   :  { %v2589_v28 = vld [vmem:[#allocation5 + $0x2a0] sm:$0xf]  ;;  %v3368_v30 = vld [vmem:[#allocation5 + $0x2ac] sm:$0xf0]  ;;  %v2462_v33 = vor.u32 %v3336_v27, %v2461_v26  ;;  %1523 = vmatpush.bf16.msra.mxu3 %v2734_v25 }
  0x20   :  { %v2717_v31 = vld [vmem:[#allocation5 + $0x3a0] sm:$0xf]  ;;  %v3400_v32 = vld [vmem:[#allocation5 + $0x3ac] sm:$0xf0]  ;;  %v2590_v34 = vor.u32 %v3368_v30, %v2589_v28  ;;  %1482 = vmatpush.bf16.msra.mxu0 %v2334_v29 }
  0x21   :  { %v2317_v35 = vld [vmem:[#allocation5 + $0x80] sm:$0xf]  ;;  %v3300_v36 = vld [vmem:[#allocation5 + $0x8c] sm:$0xf0]  ;;  %v2718_v38 = vor.u32 %v3400_v32, %v2717_v31  ;;  %1496 = vmatpush.bf16.msra.mxu1 %v2462_v33 }
  0x22   :  { %v2445_v37 = vld [vmem:[#allocation5 + $0x180] sm:$0xf]  ;;  %v3332_v39 = vld [vmem:[#allocation5 + $0x18c] sm:$0xf0]  ;;  %v2318_v44 = vor.u32 %v3300_v36, %v2317_v35  ;;  %1510 = vmatpush.bf16.msra.mxu2 %v2590_v34 }
  0x23   :  { %v2573_v40 = vld [vmem:[#allocation5 + $0x280] sm:$0xf]  ;;  %v3364_v41 = vld [vmem:[#allocation5 + $0x28c] sm:$0xf0]  ;;  %v2446_v45 = vor.u32 %v3332_v39, %v2445_v37  ;;  %1524 = vmatpush.bf16.msra.mxu3 %v2718_v38  ;;  %v3310_v37 = vld [vmem:[#allocation5 + $0xe4] sm:$0xf] }
  0x24   :  { %v2701_v42 = vld [vmem:[#allocation5 + $0x380] sm:$0xf]  ;;  %v3396_v43 = vld [vmem:[#allocation5 + $0x38c] sm:$0xf0]  ;;  %v2574_v46 = vor.u32 %v3364_v41, %v2573_v40  ;;  %1483 = vmatpush.bf16.msra.mxu0 %v2318_v44  ;;  %v2367_v38 = vld [vmem:[#allocation5 + $0xf0] sm:$0xf0] }
  0x25   :  { %v2301_v47 = vld [vmem:[#allocation5 + $0x60] sm:$0xf]  ;;  %v3296_v48 = vld [vmem:[#allocation5 + $0x6c] sm:$0xf0]  ;;  %v2702_v50 = vor.u32 %v3396_v43, %v2701_v42  ;;  %1497 = vmatpush.bf16.msra.mxu1 %v2446_v45 }
  0x26   :  { %v2429_v49 = vld [vmem:[#allocation5 + $0x160] sm:$0xf]  ;;  %v3328_v51 = vld [vmem:[#allocation5 + $0x16c] sm:$0xf0]  ;;  %v2302_v56 = vor.u32 %v3296_v48, %v2301_v47  ;;  %1511 = vmatpush.bf16.msra.mxu2 %v2574_v46  ;;  %v2370_v48 = vor.u32 %v3310_v37, %v2367_v38 }
  0x27   :  { %v2557_v52 = vld [vmem:[#allocation5 + $0x260] sm:$0xf]  ;;  %v3360_v53 = vld [vmem:[#allocation5 + $0x26c] sm:$0xf0]  ;;  %v2430_v57 = vor.u32 %v3328_v51, %v2429_v49  ;;  %1525 = vmatpush.bf16.msra.mxu3 %v2702_v50  ;;  %v3306_v50 = vld [vmem:[#allocation5 + $0xc4] sm:$0xf] }
  0x28   :  { %v2685_v54 = vld [vmem:[#allocation5 + $0x360] sm:$0xf]  ;;  %v3392_v55 = vld [vmem:[#allocation5 + $0x36c] sm:$0xf0]  ;;  %v2558_v58 = vor.u32 %v3360_v53, %v2557_v52  ;;  %1484 = vmatpush.bf16.msra.mxu0 %v2302_v56  ;;  %v2351_v51 = vld [vmem:[#allocation5 + $0xd0] sm:$0xf0] }
  0x29   :  { %v2285_v59 = vld [vmem:[#allocation5 + $0x40] sm:$0xf]  ;;  %v3292_v60 = vld [vmem:[#allocation5 + $0x4c] sm:$0xf0]  ;;  %v2686_v62 = vor.u32 %v3392_v55, %v2685_v54  ;;  %1498 = vmatpush.bf16.msra.mxu1 %v2430_v57  ;;  %v2225_v52 = vld [vmem:[#allocation2] sm:$0xf] }
  0x2a   :  { %v2413_v61 = vld [vmem:[#allocation5 + $0x140] sm:$0xf]  ;;  %v3324_v63 = vld [vmem:[#allocation5 + $0x14c] sm:$0xf0]  ;;  %v2286_v4 = vor.u32 %v3292_v60, %v2285_v59  ;;  %1512 = vmatpush.bf16.msra.mxu2 %v2558_v58  ;;  %v3278_v53 = vld [vmem:[#allocation2 + $0x18] sm:$0xf0] }
  0x2b   :  { %v2541_v0 = vld [vmem:[#allocation5 + $0x240] sm:$0xf]  ;;  %v3356_v1 = vld [vmem:[#allocation5 + $0x24c] sm:$0xf0]  ;;  %v2414_v5 = vor.u32 %v3324_v63, %v2413_v61  ;;  %1526 = vmatpush.bf16.msra.mxu3 %v2686_v62  ;;  %v3735_v57 = vor.u32 %v3278_v53, %v2225_v52  ;;  %v3279_v58 = vld [vmem:[#allocation2 + $0x20] sm:$0xf0] }
  0x2c   :  { %v2669_v2 = vld [vmem:[#allocation5 + $0x340] sm:$0xf]  ;;  %v3388_v3 = vld [vmem:[#allocation5 + $0x34c] sm:$0xf0]  ;;  %v2542_v6 = vor.u32 %v3356_v1, %v2541_v0  ;;  %1485 = vmatpush.bf16.msra.mxu0 %v2286_v4  ;;  %v2354_v1 = vor.u32 %v3306_v50, %v2351_v51  ;;  %v3302_v4 = vld [vmem:[#allocation5 + $0xa4] sm:$0xf] }
  0x2d   :  { %v2269_v7 = vld [vmem:[#allocation5 + $0x20] sm:$0xf]  ;;  %v3288_v8 = vld [vmem:[#allocation5 + $0x2c] sm:$0xf0]  ;;  %v2670_v10 = vor.u32 %v3388_v3, %v2669_v2  ;;  %1499 = vmatpush.bf16.msra.mxu1 %v2414_v5  ;;  %v2335_v5 = vld [vmem:[#allocation5 + $0xb0] sm:$0xf0] }
  0x2e   :  { %v2397_v9 = vld [vmem:[#allocation5 + $0x120] sm:$0xf]  ;;  %v3320_v11 = vld [vmem:[#allocation5 + $0x12c] sm:$0xf0]  ;;  %v2270_v16 = vor.u32 %v3288_v8, %v2269_v7  ;;  %1513 = vmatpush.bf16.msra.mxu2 %v2542_v6  ;;  %v3275_v6 = vld [vmem:[#allocation2 + $0x4] sm:$0xf] }
  0x2f   :  { %v2525_v12 = vld [vmem:[#allocation5 + $0x220] sm:$0xf]  ;;  %v3352_v13 = vld [vmem:[#allocation5 + $0x22c] sm:$0xf0]  ;;  %v2398_v19 = vor.u32 %v3320_v11, %v2397_v9  ;;  %1527 = vmatpush.bf16.msra.mxu3 %v2670_v10  ;;  %v2227_v7 = vld [vmem:[#allocation2 + $0x1c] sm:$0xf0] }
  0x30   :  { %v2653_v14 = vld [vmem:[#allocation5 + $0x320] sm:$0xf]  ;;  %v3384_v15 = vld [vmem:[#allocation5 + $0x32c] sm:$0xf0]  ;;  %v2526_v20 = vor.u32 %v3352_v13, %v2525_v12  ;;  %1486 = vmatpush.bf16.msra.mxu0 %v2270_v16  ;;  %v3741_v11 = vor.u32 %v3275_v6, %v2227_v7  ;;  %v3282_v7 = vld [vmem:[#allocation5 + $0x4] sm:$0xf] }
  0x31   :  { %v2253_v17 = vld [vmem:[#allocation5] sm:$0xf]  ;;  %v3284_v18 = vld [vmem:[#allocation5 + $0xc] sm:$0xf0]  ;;  %v2654_v24 = vor.u32 %v3384_v15, %v2653_v14  ;;  %1500 = vmatpush.bf16.msra.mxu1 %v2398_v19  ;;  %v3276_v19 = vld [vmem:[#allocation2 + $0xc] sm:$0xf] }
  0x32   :  { %v2381_v21 = vld [vmem:[#allocation5 + $0x100] sm:$0xf]  ;;  %v3316_v22 = vld [vmem:[#allocation5 + $0x10c] sm:$0xf0]  ;;  %v2254_v31 = vor.u32 %v3284_v18, %v2253_v17  ;;  %1514 = vmatpush.bf16.msra.mxu2 %v2526_v20  ;;  %v2338_v17 = vor.u32 %v3302_v4, %v2335_v5 }
  0x33   :  { %v2509_v23 = vld [vmem:[#allocation5 + $0x200] sm:$0xf]  ;;  %v3348_v25 = vld [vmem:[#allocation5 + $0x20c] sm:$0xf0]  ;;  %v2382_v35 = vor.u32 %v3316_v22, %v2381_v21  ;;  %1528 = vmatpush.bf16.msra.mxu3 %v2654_v24  ;;  %v3298_v21 = vld [vmem:[#allocation5 + $0x84] sm:$0xf] }
  0x34   :  { %v2637_v26 = vld [vmem:[#allocation5 + $0x300] sm:$0xf]  ;;  %v3380_v27 = vld [vmem:[#allocation5 + $0x30c] sm:$0xf0]  ;;  %v2510_v36 = vor.u32 %v3348_v25, %v2509_v23  ;;  %1487 = vmatpush.bf16.msra.mxu0 %v2254_v31  ;;  %v2319_v22 = vld [vmem:[#allocation5 + $0x90] sm:$0xf0] }
  0x35   :  { %v2877_v28 = vld [vmem:[#allocation5 + $0x4e0] sm:$0xf]  ;;  %v3440_v29 = vld [vmem:[#allocation5 + $0x4ec] sm:$0xf0]  ;;  %v2638_v39 = vor.u32 %v3380_v27, %v2637_v26  ;;  %1501 = vmatpush.bf16.msra.mxu1 %v2382_v35  ;;  %v2303_v35 = vld [vmem:[#allocation5 + $0x70] sm:$0xf0] }
  0x36   :  { %v3005_v30 = vld [vmem:[#allocation5 + $0x5e0] sm:$0xf]  ;;  %v3472_v32 = vld [vmem:[#allocation5 + $0x5ec] sm:$0xf0]  ;;  %v2878_v40 = vor.u32 %v3440_v29, %v2877_v28  ;;  %1515 = vmatpush.bf16.msra.mxu2 %v2510_v36 }
  0x37   :  { %v3133_v33 = vld [vmem:[#allocation5 + $0x6e0] sm:$0xf]  ;;  %v3504_v34 = vld [vmem:[#allocation5 + $0x6ec] sm:$0xf0]  ;;  %v3006_v43 = vor.u32 %v3472_v32, %v3005_v30  ;;  %1529 = vmatpush.bf16.msra.mxu3 %v2638_v39  ;;  %1488 = vmatmul.bf16.vlgmr.msra.gmra.mxu0 %v3735_v57  ;;  %v2322_v30 = vor.u32 %v3298_v21, %v2319_v22  ;;  %v2241_v22 = vld [vmem:[#allocation2 + $0x10] sm:$0xf] }
  0x38   :  { %v2861_v41 = vld [vmem:[#allocation5 + $0x4c0] sm:$0xf]  ;;  %v3436_v42 = vld [vmem:[#allocation5 + $0x4cc] sm:$0xf0]  ;;  %v3134_v44 = vor.u32 %v3504_v34, %v3133_v33  ;;  %1536 = vmatpush.bf16.msrb.mxu0 %v2878_v40  ;;  %1502 = vmatmul.bf16.vlgmr.msra.gmra.mxu1 %v3741_v11  ;;  %v3294_v34 = vld [vmem:[#allocation5 + $0x64] sm:$0xf] }
  0x39   :  { %v2989_v45 = vld [vmem:[#allocation5 + $0x5c0] sm:$0xf]  ;;  %v3468_v46 = vld [vmem:[#allocation5 + $0x5cc] sm:$0xf0]  ;;  %v2862_v55 = vor.u32 %v3436_v42, %v2861_v41  ;;  %1550 = vmatpush.bf16.msrb.mxu1 %v3006_v43  ;;  %v2306_v42 = vor.u32 %v3294_v34, %v2303_v35  ;;  %v2479_v34 = vld [vmem:[#allocation5 + $0x1d0] sm:$0xf0] }
  0x3a   :  { %v3117_v47 = vld [vmem:[#allocation5 + $0x6c0] sm:$0xf]  ;;  %v3500_v49 = vld [vmem:[#allocation5 + $0x6cc] sm:$0xf0]  ;;  %1564 = vmatpush.bf16.msrb.mxu2 %v3134_v44  ;;  %v2990_v59 = vor.u32 %v3468_v46, %v2989_v45  ;;  %v3290_v46 = vld [vmem:[#allocation5 + $0x44] sm:$0xf] }
  0x3b   :  { %v2233_v54 = vld [vmem:[#allocation2 + $0x8] sm:$0xf]  ;;  %v2845_v56 = vld [vmem:[#allocation5 + $0x4a0] sm:$0xf]  ;;  %v3118_v60 = vor.u32 %v3500_v49, %v3117_v47  ;;  %1578 = vmatpush.bf16.msrb.mxu3 %v2370_v48  ;;  %v2287_v47 = vld [vmem:[#allocation5 + $0x50] sm:$0xf0] }
  0x3c   :  { %v3432_v61 = vld [vmem:[#allocation5 + $0x4ac] sm:$0xf0]  ;;  %v2973_v62 = vld [vmem:[#allocation5 + $0x5a0] sm:$0xf]  ;;  %v3737_v0 = vor.u32 %v3279_v58, %v2233_v54  ;;  %1537 = vmatpush.bf16.msrb.mxu0 %v2862_v55  ;;  %v2290_v54 = vor.u32 %v3290_v46, %v2287_v47  ;;  %v3370_v35 = vld [vmem:[#allocation5 + $0x2c4] sm:$0xf] }
  0x3d   :  { %v3464_v63 = vld [vmem:[#allocation5 + $0x5ac] sm:$0xf0]  ;;  %v3101_v2 = vld [vmem:[#allocation5 + $0x6a0] sm:$0xf]  ;;  %v2846_v8 = vor.u32 %v3432_v61, %v2845_v56  ;;  %1551 = vmatpush.bf16.msrb.mxu1 %v2990_v59  ;;  %v3286_v59 = vld [vmem:[#allocation5 + $0x24] sm:$0xf] }
  0x3e   :  { %v3496_v3 = vld [vmem:[#allocation5 + $0x6ac] sm:$0xf0]  ;;  %1516 = vmatmul.bf16.vlgmr.msra.gmra.mxu2 %v3737_v0  ;;  %v2829_v9 = vld [vmem:[#allocation5 + $0x480] sm:$0xf]  ;;  %v2974_v12 = vor.u32 %v3464_v63, %v2973_v62 }
  0x3f   :  { %v3428_v10 = vld [vmem:[#allocation5 + $0x48c] sm:$0xf0]  ;;  %1565 = vmatpush.bf16.msrb.mxu2 %v3118_v60  ;;  %v3102_v13 = vor.u32 %v3496_v3, %v3101_v2  ;;  %v2957_v14 = vld [vmem:[#allocation5 + $0x580] sm:$0xf]  ;;  %1579 = vmatpush.bf16.msrb.mxu3 %v2354_v1  ;;  %v2271_v60 = vld [vmem:[#allocation5 + $0x30] sm:$0xf0] }
  0x40   :  { %v3460_v15 = vld [vmem:[#allocation5 + $0x58c] sm:$0xf0]  ;;  %v3085_v16 = vld [vmem:[#allocation5 + $0x680] sm:$0xf]  ;;  %1538 = vmatpush.bf16.msrb.mxu0 %v2846_v8  ;;  %v2830_v24 = vor.u32 %v3428_v10, %v2829_v9  ;;  %v2274_v8 = vor.u32 %v3286_v59, %v2271_v60  ;;  %v2255_v9 = vld [vmem:[#allocation5 + $0x10] sm:$0xf0] }
  0x41   :  { %v3492_v18 = vld [vmem:[#allocation5 + $0x68c] sm:$0xf0]  ;;  %1552 = vmatpush.bf16.msrb.mxu1 %v2974_v12  ;;  %v2958_v25 = vor.u32 %v3460_v15, %v2957_v14  ;;  %v2813_v27 = vld [vmem:[#allocation5 + $0x460] sm:$0xf]  ;;  %v3342_v10 = vld [vmem:[#allocation5 + $0x1e4] sm:$0xf] }
  0x42   :  { %v2235_v20 = vld [vmem:[#allocation2 + $0x24] sm:$0xf0]  ;;  %v3086_v26 = vor.u32 %v3492_v18, %v3085_v16  ;;  %v2941_v29 = vld [vmem:[#allocation5 + $0x560] sm:$0xf]  ;;  %v2495_v12 = vld [vmem:[#allocation5 + $0x1f0] sm:$0xf0] }
  0x43   :  { %v3744_v23 = vor.u32 %v3276_v19, %v2235_v20  ;;  %1566 = vmatpush.bf16.msrb.mxu2 %v3102_v13  ;;  %v3424_v28 = vld [vmem:[#allocation5 + $0x46c] sm:$0xf0]  ;;  %1580 = vmatpush.bf16.msrb.mxu3 %v2338_v17  ;;  %v3069_v32 = vld [vmem:[#allocation5 + $0x660] sm:$0xf]  ;;  %v3374_v13 = vld [vmem:[#allocation5 + $0x2e4] sm:$0xf] }
  0x44   :  { %v3456_v31 = vld [vmem:[#allocation5 + $0x56c] sm:$0xf0]  ;;  %1539 = vmatpush.bf16.msrb.mxu0 %v2830_v24  ;;  %v2814_v36 = vor.u32 %v3424_v28, %v2813_v27  ;;  %v2797_v39 = vld [vmem:[#allocation5 + $0x440] sm:$0xf]  ;;  %v2623_v14 = vld [vmem:[#allocation5 + $0x2f0] sm:$0xf0]  ;;  %v2498_v27 = vor.u32 %v3342_v10, %v2495_v12 }
  0x45   :  { %v3488_v33 = vld [vmem:[#allocation5 + $0x66c] sm:$0xf0]  ;;  %1530 = vmatmul.bf16.vlgmr.msra.gmra.mxu3 %v3744_v23  ;;  %1553 = vmatpush.bf16.msrb.mxu1 %v2958_v25  ;;  %v2942_v37 = vor.u32 %v3456_v31, %v2941_v29  ;;  %v2925_v41 = vld [vmem:[#allocation5 + $0x540] sm:$0xf]  ;;  %v3406_v15 = vld [vmem:[#allocation5 + $0x3e4] sm:$0xf]  ;;  %v2626_v31 = vor.u32 %v3374_v13, %v2623_v14 }
  0x46   :  { %v3070_v38 = vor.u32 %v3488_v33, %v3069_v32  ;;  %v3420_v40 = vld [vmem:[#allocation5 + $0x44c] sm:$0xf0]  ;;  %v3053_v44 = vld [vmem:[#allocation5 + $0x640] sm:$0xf]  ;;  %v2751_v17 = vld [vmem:[#allocation5 + $0x3f0] sm:$0xf0] }
  0x47   :  { %1567 = vmatpush.bf16.msrb.mxu2 %v3086_v26  ;;  %1581 = vmatpush.bf16.msrb.mxu3 %v2322_v30  ;;  %v3452_v43 = vld [vmem:[#allocation5 + $0x54c] sm:$0xf0]  ;;  %v2798_v48 = vor.u32 %v3420_v40, %v2797_v39  ;;  %v2781_v51 = vld [vmem:[#allocation5 + $0x420] sm:$0xf]  ;;  %v3438_v18 = vld [vmem:[#allocation5 + $0x4e4] sm:$0xf]  ;;  %v2258_v26 = vor.u32 %v3282_v7, %v2255_v9  ;;  %v2754_v32 = vor.u32 %v3406_v15, %v2751_v17 }
  0x48   :  { %v3484_v45 = vld [vmem:[#allocation5 + $0x64c] sm:$0xf0]  ;;  %1540 = vmatpush.bf16.msrb.mxu0 %v2814_v36  ;;  %v2926_v49 = vor.u32 %v3452_v43, %v2925_v41  ;;  %v2909_v53 = vld [vmem:[#allocation5 + $0x520] sm:$0xf]  ;;  %v2879_v19 = vld [vmem:[#allocation5 + $0x4f0] sm:$0xf0] }
  0x49   :  { %1554 = vmatpush.bf16.msrb.mxu1 %v2942_v37  ;;  %v3054_v50 = vor.u32 %v3484_v45, %v3053_v44  ;;  %v3416_v52 = vld [vmem:[#allocation5 + $0x42c] sm:$0xf0]  ;;  %v3037_v56 = vld [vmem:[#allocation5 + $0x620] sm:$0xf]  ;;  %v3280_v24 = vld [vmem:[#allocation2 + $0x28] sm:$0xf0]  ;;  %v2882_v36 = vor.u32 %v3438_v18, %v2879_v19 }
  0x4a   :  { %v3448_v55 = vld [vmem:[#allocation5 + $0x52c] sm:$0xf0]  ;;  %v2765_v61 = vld [vmem:[#allocation5 + $0x400] sm:$0xf]  ;;  %v2782_v62 = vor.u32 %v3416_v52, %v2781_v51  ;;  %v3281_v28 = vld [vmem:[#allocation2 + $0x30] sm:$0xf0]  ;;  %v3747_v37 = vor.u32 %v3280_v24, %v2241_v22 }
  0x4b   :  { %1568 = vmatpush.bf16.msrb.mxu2 %v3070_v38  ;;  %1582 = vmatpush.bf16.msrb.mxu3 %v2306_v42  ;;  %v3480_v58 = vld [vmem:[#allocation5 + $0x62c] sm:$0xf0]  ;;  %v2893_v1 = vld [vmem:[#allocation5 + $0x500] sm:$0xf]  ;;  %v2910_v3 = vor.u32 %v3448_v55, %v2909_v53  ;;  %v3277_v29 = vld [vmem:[#allocation2 + $0x14] sm:$0xf] }
  0x4c   :  { %1541 = vmatpush.bf16.msrb.mxu0 %v2798_v48  ;;  %v3412_v63 = vld [vmem:[#allocation5 + $0x40c] sm:$0xf0]  ;;  %v3038_v4 = vor.u32 %v3480_v58, %v3037_v56  ;;  %v3021_v5 = vld [vmem:[#allocation5 + $0x600] sm:$0xf]  ;;  %v2243_v30 = vld [vmem:[#allocation2 + $0x2c] sm:$0xf0] }
  0x4d   :  { %v3444_v2 = vld [vmem:[#allocation5 + $0x50c] sm:$0xf0]  ;;  %1555 = vmatpush.bf16.msrb.mxu1 %v2926_v49  ;;  %v2766_v16 = vor.u32 %v3412_v63, %v2765_v61  ;;  %v2249_v25 = vld [vmem:[#allocation2 + $0x18] sm:$0xf]  ;;  %v3338_v33 = vld [vmem:[#allocation5 + $0x1c4] sm:$0xf]  ;;  %v3751_v42 = vor.u32 %v3277_v29, %v2243_v30 }
  0x4e   :  { %v3476_v6 = vld [vmem:[#allocation5 + $0x60c] sm:$0xf0]  ;;  %v2894_v20 = vor.u32 %v3444_v2, %v2893_v1  ;;  %v2607_v38 = vld [vmem:[#allocation5 + $0x2d0] sm:$0xf0]  ;;  %v3402_v39 = vld [vmem:[#allocation5 + $0x3c4] sm:$0xf]  ;;  %v3749_v41 = vor.u32 %v3281_v28, %v2249_v25  ;;  %v2482_v45 = vor.u32 %v3338_v33, %v2479_v34 }
  0x4f   :  { %1569 = vmatpush.bf16.msrb.mxu2 %v3054_v50  ;;  %1583 = vmatpush.bf16.msrb.mxu3 %v2290_v54  ;;  %v3022_v21 = vor.u32 %v3476_v6, %v3021_v5  ;;  %v2735_v40 = vld [vmem:[#allocation5 + $0x3d0] sm:$0xf0]  ;;  %v3434_v43 = vld [vmem:[#allocation5 + $0x4c4] sm:$0xf]  ;;  %v2610_v46 = vor.u32 %v3370_v35, %v2607_v38 }
  0x50   :  { %1542 = vmatpush.bf16.msrb.mxu0 %v2782_v62  ;;  %v2863_v44 = vld [vmem:[#allocation5 + $0x4d0] sm:$0xf0]  ;;  %v2738_v47 = vor.u32 %v3402_v39, %v2735_v40  ;;  %v3334_v48 = vld [vmem:[#allocation5 + $0x1a4] sm:$0xf] }
  0x51   :  { %1556 = vmatpush.bf16.msrb.mxu1 %v2910_v3  ;;  %v2463_v49 = vld [vmem:[#allocation5 + $0x1b0] sm:$0xf0]  ;;  %v3366_v50 = vld [vmem:[#allocation5 + $0x2a4] sm:$0xf]  ;;  %v2866_v51 = vor.u32 %v3434_v43, %v2863_v44 }
  0x52   :  { %v2591_v52 = vld [vmem:[#allocation5 + $0x2b0] sm:$0xf0]  ;;  %v3398_v53 = vld [vmem:[#allocation5 + $0x3a4] sm:$0xf]  ;;  %v2466_v58 = vor.u32 %v3334_v48, %v2463_v49 }
  0x53   :  { %1570 = vmatpush.bf16.msrb.mxu2 %v3038_v4  ;;  %1584 = vmatpush.bf16.msrb.mxu3 %v2274_v8  ;;  %v2719_v54 = vld [vmem:[#allocation5 + $0x3b0] sm:$0xf0]  ;;  %v3430_v55 = vld [vmem:[#allocation5 + $0x4a4] sm:$0xf]  ;;  %v2594_v59 = vor.u32 %v3366_v50, %v2591_v52 }
  0x54   :  { %1543 = vmatpush.bf16.msrb.mxu0 %v2766_v16  ;;  %v2847_v56 = vld [vmem:[#allocation5 + $0x4b0] sm:$0xf0]  ;;  %v2722_v60 = vor.u32 %v3398_v53, %v2719_v54  ;;  %v3330_v61 = vld [vmem:[#allocation5 + $0x184] sm:$0xf] }
  0x55   :  { %1557 = vmatpush.bf16.msrb.mxu1 %v2894_v20  ;;  %v2447_v62 = vld [vmem:[#allocation5 + $0x190] sm:$0xf0]  ;;  %v3362_v63 = vld [vmem:[#allocation5 + $0x284] sm:$0xf]  ;;  %v2850_v1 = vor.u32 %v3430_v55, %v2847_v56 }
  0x56   :  { %v2575_v2 = vld [vmem:[#allocation5 + $0x290] sm:$0xf0]  ;;  %v3394_v3 = vld [vmem:[#allocation5 + $0x384] sm:$0xf]  ;;  %v2450_v7 = vor.u32 %v3330_v61, %v2447_v62 }
  0x57   :  { %1571 = vmatpush.bf16.msrb.mxu2 %v3022_v21  ;;  %1585 = vmatpush.bf16.msrb.mxu3 %v2258_v26  ;;  %v2703_v4 = vld [vmem:[#allocation5 + $0x390] sm:$0xf0]  ;;  %v3426_v5 = vld [vmem:[#allocation5 + $0x484] sm:$0xf]  ;;  %v2578_v8 = vor.u32 %v3362_v63, %v2575_v2 }
  0x58   :  { %1592 = vmatpush.bf16.msra.mxu0 %v2498_v27  ;;  %1558 = vmatmul.bf16.vlgmr.msrb.gmra.mxu1 %v3751_v42  ;;  %v2831_v6 = vld [vmem:[#allocation5 + $0x490] sm:$0xf0]  ;;  %v2706_v9 = vor.u32 %v3394_v3, %v2703_v4  ;;  %v3326_v10 = vld [vmem:[#allocation5 + $0x164] sm:$0xf]  ;;  %v2373_v3 = vld [vmem:[#allocation5 + $0xe8] sm:$0xf] }
  0x59   :  { %1606 = vmatpush.bf16.msra.mxu1 %v2626_v31  ;;  %1544 = vmatmul.bf16.vlgmr.msrb.gmra.mxu0 %v3747_v37  ;;  %v2431_v12 = vld [vmem:[#allocation5 + $0x170] sm:$0xf0]  ;;  %v3358_v13 = vld [vmem:[#allocation5 + $0x264] sm:$0xf]  ;;  %v2834_v14 = vor.u32 %v3426_v5, %v2831_v6  ;;  %v3313_v4 = vld [vmem:[#allocation5 + $0xf4] sm:$0xf0] }
  0x5a   :  { %1572 = vmatmul.bf16.vlgmr.msrb.gmra.mxu2 %v3749_v41  ;;  %1586 = vmatmul.bf16.vlgmr.msrb.gmra.mxu3 %v3735_v57  ;;  %v2559_v15 = vld [vmem:[#allocation5 + $0x270] sm:$0xf0]  ;;  %v3390_v16 = vld [vmem:[#allocation5 + $0x364] sm:$0xf]  ;;  %v2434_v20 = vor.u32 %v3326_v10, %v2431_v12 }
  0x5b   :  { %1620 = vmatpush.bf16.msra.mxu2 %v2754_v32  ;;  %1634 = vmatpush.bf16.msra.mxu3 %v2882_v36  ;;  %v2687_v17 = vld [vmem:[#allocation5 + $0x370] sm:$0xf0]  ;;  %v3422_v18 = vld [vmem:[#allocation5 + $0x464] sm:$0xf]  ;;  %v2562_v21 = vor.u32 %v3358_v13, %v2559_v15  ;;  %v2374_v13 = vor.u32 %v3313_v4, %v2373_v3 }
  0x5c   :  { %1593 = vmatpush.bf16.msra.mxu0 %v2482_v45  ;;  %v2815_v19 = vld [vmem:[#allocation5 + $0x470] sm:$0xf0]  ;;  %v2690_v22 = vor.u32 %v3390_v16, %v2687_v17  ;;  %v3322_v24 = vld [vmem:[#allocation5 + $0x144] sm:$0xf] }
  0x5d   :  { %1607 = vmatpush.bf16.msra.mxu1 %v2610_v46  ;;  %v2415_v25 = vld [vmem:[#allocation5 + $0x150] sm:$0xf0]  ;;  %v3354_v26 = vld [vmem:[#allocation5 + $0x244] sm:$0xf]  ;;  %v2818_v27 = vor.u32 %v3422_v18, %v2815_v19  ;;  %v2357_v19 = vld [vmem:[#allocation5 + $0xc8] sm:$0xf] }
  0x5e   :  { %v2543_v28 = vld [vmem:[#allocation5 + $0x250] sm:$0xf0]  ;;  %v3386_v29 = vld [vmem:[#allocation5 + $0x344] sm:$0xf]  ;;  %v2418_v33 = vor.u32 %v3322_v24, %v2415_v25 }
  0x5f   :  { %1621 = vmatpush.bf16.msra.mxu2 %v2738_v47  ;;  %1635 = vmatpush.bf16.msra.mxu3 %v2866_v51  ;;  %v2671_v30 = vld [vmem:[#allocation5 + $0x350] sm:$0xf0]  ;;  %v3418_v31 = vld [vmem:[#allocation5 + $0x444] sm:$0xf]  ;;  %v2546_v34 = vor.u32 %v3354_v26, %v2543_v28 }
  0x60   :  { %1594 = vmatpush.bf16.msra.mxu0 %v2466_v58  ;;  %v2799_v32 = vld [vmem:[#allocation5 + $0x450] sm:$0xf0]  ;;  %v2674_v35 = vor.u32 %v3386_v29, %v2671_v30  ;;  %v3318_v36 = vld [vmem:[#allocation5 + $0x124] sm:$0xf] }
  0x61   :  { %1608 = vmatpush.bf16.msra.mxu1 %v2594_v59  ;;  %v2399_v38 = vld [vmem:[#allocation5 + $0x130] sm:$0xf0]  ;;  %v3350_v39 = vld [vmem:[#allocation5 + $0x224] sm:$0xf]  ;;  %v2802_v40 = vor.u32 %v3418_v31, %v2799_v32  ;;  %v2341_v32 = vld [vmem:[#allocation5 + $0xa8] sm:$0xf] }
  0x62   :  { %v2527_v43 = vld [vmem:[#allocation5 + $0x230] sm:$0xf0]  ;;  %v3382_v44 = vld [vmem:[#allocation5 + $0x324] sm:$0xf]  ;;  %v2402_v48 = vor.u32 %v3318_v36, %v2399_v38 }
  0x63   :  { %1622 = vmatpush.bf16.msra.mxu2 %v2722_v60  ;;  %1636 = vmatpush.bf16.msra.mxu3 %v2850_v1  ;;  %v2655_v45 = vld [vmem:[#allocation5 + $0x330] sm:$0xf0]  ;;  %v3414_v46 = vld [vmem:[#allocation5 + $0x424] sm:$0xf]  ;;  %v2530_v51 = vor.u32 %v3350_v39, %v2527_v43 }
  0x64   :  { %1595 = vmatpush.bf16.msra.mxu0 %v2450_v7  ;;  %v2783_v47 = vld [vmem:[#allocation5 + $0x430] sm:$0xf0]  ;;  %v3314_v49 = vld [vmem:[#allocation5 + $0x104] sm:$0xf]  ;;  %v2658_v52 = vor.u32 %v3382_v44, %v2655_v45  ;;  %v2501_v7 = vld [vmem:[#allocation5 + $0x1e8] sm:$0xf] }
  0x65   :  { %1609 = vmatpush.bf16.msra.mxu1 %v2578_v8  ;;  %v2383_v50 = vld [vmem:[#allocation5 + $0x110] sm:$0xf0]  ;;  %v3346_v53 = vld [vmem:[#allocation5 + $0x204] sm:$0xf]  ;;  %v2786_v56 = vor.u32 %v3414_v46, %v2783_v47  ;;  %v3345_v8 = vld [vmem:[#allocation5 + $0x1f4] sm:$0xf0] }
  0x66   :  { %v2511_v54 = vld [vmem:[#allocation5 + $0x210] sm:$0xf0]  ;;  %v3378_v55 = vld [vmem:[#allocation5 + $0x304] sm:$0xf]  ;;  %v2386_v1 = vor.u32 %v3314_v49, %v2383_v50  ;;  %v2502_v17 = vor.u32 %v3345_v8, %v2501_v7  ;;  %v2325_v47 = vld [vmem:[#allocation5 + $0x88] sm:$0xf] }
  0x67   :  { %1623 = vmatpush.bf16.msra.mxu2 %v2706_v9  ;;  %1637 = vmatpush.bf16.msra.mxu3 %v2834_v14  ;;  %v2639_v58 = vld [vmem:[#allocation5 + $0x310] sm:$0xf0]  ;;  %v3410_v59 = vld [vmem:[#allocation5 + $0x404] sm:$0xf]  ;;  %v2514_v5 = vor.u32 %v3346_v53, %v2511_v54  ;;  %v2453_v49 = vld [vmem:[#allocation5 + $0x188] sm:$0xf] }
  0x68   :  { %1596 = vmatpush.bf16.msra.mxu0 %v2434_v20  ;;  %v2767_v60 = vld [vmem:[#allocation5 + $0x410] sm:$0xf0]  ;;  %v3470_v61 = vld [vmem:[#allocation5 + $0x5e4] sm:$0xf]  ;;  %v2642_v6 = vor.u32 %v3378_v55, %v2639_v58  ;;  %v3309_v20 = vld [vmem:[#allocation5 + $0xd4] sm:$0xf0] }
  0x69   :  { %1610 = vmatpush.bf16.msra.mxu1 %v2562_v21  ;;  %v3007_v62 = vld [vmem:[#allocation5 + $0x5f0] sm:$0xf0]  ;;  %v3502_v63 = vld [vmem:[#allocation5 + $0x6e4] sm:$0xf]  ;;  %v2770_v9 = vor.u32 %v3410_v59, %v2767_v60  ;;  %v2485_v21 = vld [vmem:[#allocation5 + $0x1c8] sm:$0xf]  ;;  %v2358_v26 = vor.u32 %v3309_v20, %v2357_v19 }
  0x6a   :  { %v3135_v2 = vld [vmem:[#allocation5 + $0x6f0] sm:$0xf0]  ;;  %v3010_v10 = vor.u32 %v3470_v61, %v3007_v62  ;;  %v3466_v14 = vld [vmem:[#allocation5 + $0x5c4] sm:$0xf]  ;;  %v3333_v50 = vld [vmem:[#allocation5 + $0x194] sm:$0xf0] }
  0x6b   :  { %1624 = vmatpush.bf16.msra.mxu2 %v2690_v22  ;;  %1638 = vmatpush.bf16.msra.mxu3 %v2818_v27  ;;  %v3138_v12 = vor.u32 %v3502_v63, %v3135_v2  ;;  %v2991_v15 = vld [vmem:[#allocation5 + $0x5d0] sm:$0xf0]  ;;  %v3498_v16 = vld [vmem:[#allocation5 + $0x6c4] sm:$0xf]  ;;  %v3341_v22 = vld [vmem:[#allocation5 + $0x1d4] sm:$0xf0]  ;;  %v2454_v58 = vor.u32 %v3333_v50, %v2453_v49 }
  0x6c   :  { %1597 = vmatpush.bf16.msra.mxu0 %v2418_v33  ;;  %v3119_v18 = vld [vmem:[#allocation5 + $0x6d0] sm:$0xf0]  ;;  %v2994_v24 = vor.u32 %v3466_v14, %v2991_v15  ;;  %v3462_v27 = vld [vmem:[#allocation5 + $0x5a4] sm:$0xf]  ;;  %v2486_v30 = vor.u32 %v3341_v22, %v2485_v21  ;;  %v3305_v33 = vld [vmem:[#allocation5 + $0xb4] sm:$0xf0] }
  0x6d   :  { %1611 = vmatpush.bf16.msra.mxu1 %v2546_v34  ;;  %v3122_v25 = vor.u32 %v3498_v16, %v3119_v18  ;;  %v2975_v28 = vld [vmem:[#allocation5 + $0x5b0] sm:$0xf0]  ;;  %v3494_v29 = vld [vmem:[#allocation5 + $0x6a4] sm:$0xf]  ;;  %v2469_v34 = vld [vmem:[#allocation5 + $0x1a8] sm:$0xf]  ;;  %v2342_v39 = vor.u32 %v3305_v33, %v2341_v32 }
  0x6e   :  { %v3103_v31 = vld [vmem:[#allocation5 + $0x6b0] sm:$0xf0]  ;;  %v2978_v36 = vor.u32 %v3462_v27, %v2975_v28  ;;  %v3490_v44 = vld [vmem:[#allocation5 + $0x684] sm:$0xf]  ;;  %v2309_v60 = vld [vmem:[#allocation5 + $0x68] sm:$0xf] }
  0x6f   :  { %1625 = vmatpush.bf16.msra.mxu2 %v2674_v35  ;;  %1639 = vmatpush.bf16.msra.mxu3 %v2802_v40  ;;  %v3337_v35 = vld [vmem:[#allocation5 + $0x1b4] sm:$0xf0]  ;;  %v3106_v38 = vor.u32 %v3494_v29, %v3103_v31  ;;  %v3458_v40 = vld [vmem:[#allocation5 + $0x584] sm:$0xf]  ;;  %v2959_v43 = vld [vmem:[#allocation5 + $0x590] sm:$0xf0] }
  0x70   :  { %1598 = vmatpush.bf16.msra.mxu0 %v2402_v48  ;;  %v2470_v45 = vor.u32 %v3337_v35, %v2469_v34  ;;  %v3087_v46 = vld [vmem:[#allocation5 + $0x690] sm:$0xf0]  ;;  %v3301_v48 = vld [vmem:[#allocation5 + $0x94] sm:$0xf0]  ;;  %v3454_v54 = vld [vmem:[#allocation5 + $0x564] sm:$0xf] }
  0x71   :  { %1612 = vmatpush.bf16.msra.mxu1 %v2530_v51  ;;  %v2962_v51 = vor.u32 %v3458_v40, %v2959_v43  ;;  %v2326_v53 = vor.u32 %v3301_v48, %v2325_v47  ;;  %v2943_v55 = vld [vmem:[#allocation5 + $0x570] sm:$0xf0]  ;;  %v3297_v61 = vld [vmem:[#allocation5 + $0x74] sm:$0xf0]  ;;  %v2437_v62 = vld [vmem:[#allocation5 + $0x168] sm:$0xf] }
  0x72   :  { %v3071_v59 = vld [vmem:[#allocation5 + $0x670] sm:$0xf0]  ;;  %v3329_v63 = vld [vmem:[#allocation5 + $0x174] sm:$0xf0]  ;;  %v2310_v3 = vor.u32 %v3297_v61, %v2309_v60  ;;  %v3450_v4 = vld [vmem:[#allocation5 + $0x544] sm:$0xf] }
  0x73   :  { %1626 = vmatpush.bf16.msra.mxu2 %v2658_v52  ;;  %1640 = vmatpush.bf16.msra.mxu3 %v2786_v56  ;;  %v3090_v52 = vor.u32 %v3490_v44, %v3087_v46  ;;  %v3486_v56 = vld [vmem:[#allocation5 + $0x664] sm:$0xf]  ;;  %v2438_v7 = vor.u32 %v3329_v63, %v2437_v62  ;;  %v3055_v8 = vld [vmem:[#allocation5 + $0x650] sm:$0xf0]  ;;  %v2277_v22 = vld [vmem:[#allocation5 + $0x28] sm:$0xf] }
  0x74   :  { %1599 = vmatpush.bf16.msra.mxu0 %v2386_v1  ;;  %v2946_v1 = vor.u32 %v3454_v54, %v2943_v55  ;;  %v3074_v2 = vor.u32 %v3486_v56, %v3071_v59  ;;  %v2911_v18 = vld [vmem:[#allocation5 + $0x530] sm:$0xf0]  ;;  %v3478_v19 = vld [vmem:[#allocation5 + $0x624] sm:$0xf]  ;;  %v2261_v34 = vld [vmem:[#allocation5 + $0x8] sm:$0xf] }
  0x75   :  { %1613 = vmatpush.bf16.msra.mxu1 %v2514_v5  ;;  %v2927_v5 = vld [vmem:[#allocation5 + $0x550] sm:$0xf0]  ;;  %v3442_v28 = vld [vmem:[#allocation5 + $0x504] sm:$0xf]  ;;  %v2629_v40 = vld [vmem:[#allocation5 + $0x2e8] sm:$0xf] }
  0x76   :  { %v2930_v14 = vor.u32 %v3450_v4, %v2927_v5  ;;  %v3039_v21 = vld [vmem:[#allocation5 + $0x630] sm:$0xf0]  ;;  %v3474_v32 = vld [vmem:[#allocation5 + $0x604] sm:$0xf]  ;;  %v3377_v43 = vld [vmem:[#allocation5 + $0x2f4] sm:$0xf0] }
  0x77   :  { %1627 = vmatpush.bf16.msra.mxu2 %v2642_v6  ;;  %1641 = vmatpush.bf16.msra.mxu3 %v2770_v9  ;;  %v3482_v6 = vld [vmem:[#allocation5 + $0x644] sm:$0xf]  ;;  %v2293_v9 = vld [vmem:[#allocation5 + $0x48] sm:$0xf]  ;;  %v2895_v29 = vld [vmem:[#allocation5 + $0x510] sm:$0xf0]  ;;  %v2630_v54 = vor.u32 %v3377_v43, %v2629_v40 }
  0x78   :  { %1648 = vmatpush.bf16.msrb.mxu0 %v3010_v10  ;;  %1614 = vmatmul.bf16.vlgmr.msra.gmra.mxu1 %v3737_v0  ;;  %v3293_v10 = vld [vmem:[#allocation5 + $0x54] sm:$0xf0]  ;;  %v3058_v15 = vor.u32 %v3482_v6, %v3055_v8  ;;  %v3023_v33 = vld [vmem:[#allocation5 + $0x610] sm:$0xf0]  ;;  %v2757_v44 = vld [vmem:[#allocation5 + $0x3e8] sm:$0xf] }
  0x79   :  { %1662 = vmatpush.bf16.msrb.mxu1 %v3138_v12  ;;  %1600 = vmatmul.bf16.vlgmr.msra.gmra.mxu0 %v3741_v11  ;;  %v2421_v12 = vld [vmem:[#allocation5 + $0x148] sm:$0xf]  ;;  %v2294_v16 = vor.u32 %v3293_v10, %v2293_v9  ;;  %v3409_v46 = vld [vmem:[#allocation5 + $0x3f4] sm:$0xf0]  ;;  %v3026_v49 = vor.u32 %v3474_v32, %v3023_v33 }
  0x7a   :  { %1628 = vmatmul.bf16.vlgmr.msra.gmra.mxu2 %v3744_v23  ;;  %1642 = vmatmul.bf16.vlgmr.msra.gmra.mxu3 %v3747_v37  ;;  %v2885_v47 = vld [vmem:[#allocation5 + $0x4e8] sm:$0xf]  ;;  %v3441_v48 = vld [vmem:[#allocation5 + $0x4f4] sm:$0xf0]  ;;  %v2758_v55 = vor.u32 %v3409_v46, %v2757_v44 }
  0x7b   :  { %1676 = vmatpush.bf16.msrb.mxu2 %v2374_v13  ;;  %1690 = vmatpush.bf16.msrb.mxu3 %v2502_v17  ;;  %v3325_v13 = vld [vmem:[#allocation5 + $0x154] sm:$0xf0]  ;;  %v3446_v17 = vld [vmem:[#allocation5 + $0x524] sm:$0xf]  ;;  %v2886_v56 = vor.u32 %v3441_v48, %v2885_v47  ;;  %v2741_v60 = vld [vmem:[#allocation5 + $0x3c8] sm:$0xf] }
  0x7c   :  { %1649 = vmatpush.bf16.msrb.mxu0 %v2994_v24  ;;  %v2422_v20 = vor.u32 %v3325_v13, %v2421_v12  ;;  %v3289_v24 = vld [vmem:[#allocation5 + $0x34] sm:$0xf0]  ;;  %v2914_v27 = vor.u32 %v3446_v17, %v2911_v18  ;;  %v2869_v63 = vld [vmem:[#allocation5 + $0x4c8] sm:$0xf] }
  0x7d   :  { %1663 = vmatpush.bf16.msrb.mxu1 %v3122_v25  ;;  %v2405_v25 = vld [vmem:[#allocation5 + $0x128] sm:$0xf]  ;;  %v2278_v31 = vor.u32 %v3289_v24, %v2277_v22  ;;  %v3373_v59 = vld [vmem:[#allocation5 + $0x2d4] sm:$0xf0] }
  0x7e   :  { %v3405_v62 = vld [vmem:[#allocation5 + $0x3d4] sm:$0xf0]  ;;  %v2725_v9 = vld [vmem:[#allocation5 + $0x3a8] sm:$0xf] }
  0x7f   :  { %1677 = vmatpush.bf16.msrb.mxu2 %v2358_v26  ;;  %1691 = vmatpush.bf16.msrb.mxu3 %v2486_v30  ;;  %v3321_v26 = vld [vmem:[#allocation5 + $0x134] sm:$0xf0]  ;;  %v3042_v30 = vor.u32 %v3478_v19, %v3039_v21  ;;  %v2742_v5 = vor.u32 %v3405_v62, %v2741_v60  ;;  %v2853_v13 = vld [vmem:[#allocation5 + $0x4a8] sm:$0xf] }
  0x80   :  { %1650 = vmatpush.bf16.msrb.mxu0 %v2978_v36  ;;  %v2406_v35 = vor.u32 %v3321_v26, %v2405_v25  ;;  %v3285_v36 = vld [vmem:[#allocation5 + $0x14] sm:$0xf0]  ;;  %v2709_v22 = vld [vmem:[#allocation5 + $0x388] sm:$0xf] }
  0x81   :  { %1664 = vmatpush.bf16.msrb.mxu1 %v3106_v38  ;;  %v2389_v38 = vld [vmem:[#allocation5 + $0x108] sm:$0xf]  ;;  %v2262_v50 = vor.u32 %v3285_v36, %v2261_v34  ;;  %v3369_v8 = vld [vmem:[#allocation5 + $0x2b4] sm:$0xf0] }
  0x82   :  { %v3401_v12 = vld [vmem:[#allocation5 + $0x3b4] sm:$0xf0]  ;;  %v2837_v26 = vld [vmem:[#allocation5 + $0x488] sm:$0xf] }
  0x83   :  { %1678 = vmatpush.bf16.msrb.mxu2 %v2342_v39  ;;  %1692 = vmatpush.bf16.msrb.mxu3 %v2470_v45  ;;  %v3317_v39 = vld [vmem:[#allocation5 + $0x114] sm:$0xf0]  ;;  %v2898_v45 = vor.u32 %v3442_v28, %v2895_v29  ;;  %v2726_v18 = vor.u32 %v3401_v12, %v2725_v9  ;;  %v2965_v28 = vld [vmem:[#allocation5 + $0x588] sm:$0xf] }
  0x84   :  { %1651 = vmatpush.bf16.msrb.mxu0 %v2962_v51  ;;  %v3013_v51 = vld [vmem:[#allocation5 + $0x5e8] sm:$0xf]  ;;  %v3365_v21 = vld [vmem:[#allocation5 + $0x294] sm:$0xf0] }
  0x85   :  { %1665 = vmatpush.bf16.msrb.mxu1 %v3090_v52  ;;  %v3473_v52 = vld [vmem:[#allocation5 + $0x5f4] sm:$0xf0]  ;;  %v2565_v33 = vld [vmem:[#allocation5 + $0x268] sm:$0xf] }
  0x86   :  { %v3014_v61 = vor.u32 %v3473_v52, %v3013_v51  ;;  %v3397_v25 = vld [vmem:[#allocation5 + $0x394] sm:$0xf0]  ;;  %v2949_v43 = vld [vmem:[#allocation5 + $0x568] sm:$0xf] }
  0x87   :  { %1679 = vmatpush.bf16.msrb.mxu2 %v2326_v53  ;;  %1693 = vmatpush.bf16.msrb.mxu3 %v2454_v58  ;;  %v2390_v53 = vor.u32 %v3317_v39, %v2389_v38  ;;  %v2613_v58 = vld [vmem:[#allocation5 + $0x2c8] sm:$0xf]  ;;  %v3461_v29 = vld [vmem:[#allocation5 + $0x594] sm:$0xf0] }
  0x88   :  { %1652 = vmatpush.bf16.msrb.mxu0 %v2946_v1  ;;  %v3437_v1 = vld [vmem:[#allocation5 + $0x4d4] sm:$0xf0]  ;;  %v2614_v4 = vor.u32 %v3373_v59, %v2613_v58  ;;  %v2966_v36 = vor.u32 %v3461_v29, %v2965_v28  ;;  %v2821_v39 = vld [vmem:[#allocation5 + $0x468] sm:$0xf] }
  0x89   :  { %1666 = vmatpush.bf16.msrb.mxu1 %v3074_v2  ;;  %v2997_v2 = vld [vmem:[#allocation5 + $0x5c8] sm:$0xf]  ;;  %v2870_v6 = vor.u32 %v3437_v1, %v2869_v63  ;;  %v3361_v34 = vld [vmem:[#allocation5 + $0x274] sm:$0xf0] }
  0x8a   :  { %v3393_v38 = vld [vmem:[#allocation5 + $0x374] sm:$0xf0]  ;;  %v2549_v48 = vld [vmem:[#allocation5 + $0x248] sm:$0xf] }
  0x8b   :  { %1680 = vmatpush.bf16.msrb.mxu2 %v2310_v3  ;;  %1694 = vmatpush.bf16.msrb.mxu3 %v2438_v7  ;;  %v3469_v3 = vld [vmem:[#allocation5 + $0x5d4] sm:$0xf0]  ;;  %v2597_v7 = vld [vmem:[#allocation5 + $0x2a8] sm:$0xf] }
  0x8c   :  { %1653 = vmatpush.bf16.msrb.mxu0 %v2930_v14  ;;  %v2998_v10 = vor.u32 %v3469_v3, %v2997_v2  ;;  %v3433_v14 = vld [vmem:[#allocation5 + $0x4b4] sm:$0xf0]  ;;  %v2598_v17 = vor.u32 %v3369_v8, %v2597_v7  ;;  %v2661_v63 = vld [vmem:[#allocation5 + $0x328] sm:$0xf] }
  0x8d   :  { %1667 = vmatpush.bf16.msrb.mxu1 %v3058_v15  ;;  %v2981_v15 = vld [vmem:[#allocation5 + $0x5a8] sm:$0xf]  ;;  %v2854_v19 = vor.u32 %v3433_v14, %v2853_v13  ;;  %v3425_v40 = vld [vmem:[#allocation5 + $0x474] sm:$0xf0] }
  0x8e   :  { %v3457_v44 = vld [vmem:[#allocation5 + $0x574] sm:$0xf0]  ;;  %v2822_v47 = vor.u32 %v3425_v40, %v2821_v39  ;;  %v2789_v3 = vld [vmem:[#allocation5 + $0x428] sm:$0xf]  ;;  %v3307_v39 = vld [vmem:[#allocation5 + $0xcc] sm:$0xf] }
  0x8f   :  { %1681 = vmatpush.bf16.msrb.mxu2 %v2294_v16  ;;  %1695 = vmatpush.bf16.msrb.mxu3 %v2422_v20  ;;  %v3465_v16 = vld [vmem:[#allocation5 + $0x5b4] sm:$0xf0]  ;;  %v2581_v20 = vld [vmem:[#allocation5 + $0x288] sm:$0xf]  ;;  %v2950_v51 = vor.u32 %v3457_v44, %v2949_v43  ;;  %v2359_v43 = vld [vmem:[#allocation5 + $0xd8] sm:$0xf0] }
  0x90   :  { %1654 = vmatpush.bf16.msrb.mxu0 %v2914_v27  ;;  %v2982_v24 = vor.u32 %v3465_v16, %v2981_v15  ;;  %v3429_v27 = vld [vmem:[#allocation5 + $0x494] sm:$0xf0]  ;;  %v2517_v8 = vld [vmem:[#allocation5 + $0x208] sm:$0xf]  ;;  %v3339_v44 = vld [vmem:[#allocation5 + $0x1cc] sm:$0xf] }
  0x91   :  { %1668 = vmatpush.bf16.msrb.mxu1 %v3042_v30  ;;  %v2582_v30 = vor.u32 %v3365_v21, %v2581_v20  ;;  %v2838_v32 = vor.u32 %v3429_v27, %v2837_v26  ;;  %v3389_v52 = vld [vmem:[#allocation5 + $0x354] sm:$0xf0]  ;;  %v2645_v13 = vld [vmem:[#allocation5 + $0x308] sm:$0xf]  ;;  %v3343_v26 = vld [vmem:[#allocation5 + $0x1ec] sm:$0xf] }
  0x92   :  { %v3353_v62 = vld [vmem:[#allocation5 + $0x234] sm:$0xf0]  ;;  %v2773_v15 = vld [vmem:[#allocation5 + $0x408] sm:$0xf]  ;;  %v2503_v27 = vld [vmem:[#allocation5 + $0x1f8] sm:$0xf0] }
  0x93   :  { %1682 = vmatpush.bf16.msrb.mxu2 %v2278_v31  ;;  %1696 = vmatpush.bf16.msrb.mxu3 %v2406_v35  ;;  %v2710_v31 = vor.u32 %v3397_v25, %v2709_v22  ;;  %v2693_v35 = vld [vmem:[#allocation5 + $0x368] sm:$0xf]  ;;  %v3385_v2 = vld [vmem:[#allocation5 + $0x334] sm:$0xf0]  ;;  %v3311_v22 = vld [vmem:[#allocation5 + $0xec] sm:$0xf] }
  0x94   :  { %1655 = vmatpush.bf16.msrb.mxu0 %v2898_v45  ;;  %v2566_v45 = vor.u32 %v3361_v34, %v2565_v33  ;;  %v2694_v46 = vor.u32 %v3393_v38, %v2693_v35  ;;  %v3349_v9 = vld [vmem:[#allocation5 + $0x214] sm:$0xf0]  ;;  %v3141_v20 = vld [vmem:[#allocation5 + $0x6e8] sm:$0xf]  ;;  %v2375_v25 = vld [vmem:[#allocation5 + $0xf8] sm:$0xf0]  ;;  %v2506_v35 = vor.u32 %v3343_v26, %v2503_v27 }
  0x95   :  { %1669 = vmatpush.bf16.msrb.mxu1 %v3026_v49  ;;  %v3357_v49 = vld [vmem:[#allocation5 + $0x254] sm:$0xf0]  ;;  %v2378_v34 = vor.u32 %v3311_v22, %v2375_v25  ;;  %v2567_v22 = vld [vmem:[#allocation5 + $0x278] sm:$0xf0]  ;;  %v3061_v27 = vld [vmem:[#allocation5 + $0x648] sm:$0xf] }
  0x96   :  { %v2550_v58 = vor.u32 %v3357_v49, %v2549_v48  ;;  %v3381_v14 = vld [vmem:[#allocation5 + $0x314] sm:$0xf0]  ;;  %v2362_v49 = vor.u32 %v3307_v39, %v2359_v43 }
  0x97   :  { %1683 = vmatpush.bf16.msrb.mxu2 %v2262_v50  ;;  %1697 = vmatpush.bf16.msrb.mxu3 %v2390_v53  ;;  %v2677_v50 = vld [vmem:[#allocation5 + $0x348] sm:$0xf]  ;;  %v3505_v21 = vld [vmem:[#allocation5 + $0x6f4] sm:$0xf0]  ;;  %v2646_v28 = vor.u32 %v3381_v14, %v2645_v13 }
  0x98   :  { %1704 = vmatpush.bf16.msra.mxu0 %v2630_v54  ;;  %1670 = vmatmul.bf16.vlgmr.msrb.gmra.mxu1 %v3749_v41  ;;  %v2805_v53 = vld [vmem:[#allocation5 + $0x448] sm:$0xf]  ;;  %v3421_v54 = vld [vmem:[#allocation5 + $0x454] sm:$0xf0]  ;;  %v2678_v59 = vor.u32 %v3389_v52, %v2677_v50  ;;  %v3142_v33 = vor.u32 %v3505_v21, %v3141_v20  ;;  %v2439_v20 = vld [vmem:[#allocation5 + $0x178] sm:$0xf0] }
  0x99   :  { %1718 = vmatpush.bf16.msra.mxu1 %v2758_v55  ;;  %1656 = vmatmul.bf16.vlgmr.msrb.gmra.mxu0 %v3751_v42  ;;  %v2933_v55 = vld [vmem:[#allocation5 + $0x548] sm:$0xf]  ;;  %v2806_v60 = vor.u32 %v3421_v54, %v2805_v53  ;;  %v3501_v38 = vld [vmem:[#allocation5 + $0x6d4] sm:$0xf0]  ;;  %v3303_v53 = vld [vmem:[#allocation5 + $0xac] sm:$0xf] }
  0x9a   :  { %1684 = vmatmul.bf16.vlgmr.msrb.gmra.mxu2 %v3735_v57  ;;  %1698 = vmatmul.bf16.vlgmr.msrb.gmra.mxu3 %v3741_v11  ;;  %v3497_v52 = vld [vmem:[#allocation5 + $0x6b4] sm:$0xf0]  ;;  %v3077_v14 = vld [vmem:[#allocation5 + $0x668] sm:$0xf]  ;;  %v3359_v21 = vld [vmem:[#allocation5 + $0x26c] sm:$0xf] }
  0x9b   :  { %1732 = vmatpush.bf16.msra.mxu2 %v2886_v56  ;;  %1746 = vmatpush.bf16.msra.mxu3 %v3014_v61  ;;  %v3453_v56 = vld [vmem:[#allocation5 + $0x554] sm:$0xf0]  ;;  %v2533_v61 = vld [vmem:[#allocation5 + $0x228] sm:$0xf] }
  0x9c   :  { %1705 = vmatpush.bf16.msra.mxu0 %v2614_v4  ;;  %v2934_v1 = vor.u32 %v3453_v56, %v2933_v55  ;;  %v3417_v4 = vld [vmem:[#allocation5 + $0x434] sm:$0xf0]  ;;  %v2534_v7 = vor.u32 %v3353_v62, %v2533_v61  ;;  %v2343_v55 = vld [vmem:[#allocation5 + $0xb8] sm:$0xf0]  ;;  %v3335_v56 = vld [vmem:[#allocation5 + $0x1ac] sm:$0xf] }
  0x9d   :  { %1719 = vmatpush.bf16.msra.mxu1 %v2742_v5  ;;  %v2917_v5 = vld [vmem:[#allocation5 + $0x528] sm:$0xf]  ;;  %v2790_v12 = vor.u32 %v3417_v4, %v2789_v3  ;;  %v2346_v62 = vor.u32 %v3303_v53, %v2343_v55  ;;  %v3299_v3 = vld [vmem:[#allocation5 + $0x8c] sm:$0xf]  ;;  %v3481_v43 = vld [vmem:[#allocation5 + $0x634] sm:$0xf0] }
  0x9e   :  { %v3477_v53 = vld [vmem:[#allocation5 + $0x614] sm:$0xf0] }
  0x9f   :  { %1733 = vmatpush.bf16.msra.mxu2 %v2870_v6  ;;  %1747 = vmatpush.bf16.msra.mxu3 %v2998_v10  ;;  %v3449_v6 = vld [vmem:[#allocation5 + $0x534] sm:$0xf0]  ;;  %v2662_v10 = vor.u32 %v3385_v2, %v2661_v63 }
  0xa0   :  { %1706 = vmatpush.bf16.msra.mxu0 %v2598_v17  ;;  %v2918_v16 = vor.u32 %v3449_v6, %v2917_v5  ;;  %v3413_v17 = vld [vmem:[#allocation5 + $0x414] sm:$0xf0]  ;;  %v2327_v5 = vld [vmem:[#allocation5 + $0x98] sm:$0xf0]  ;;  %v3331_v6 = vld [vmem:[#allocation5 + $0x18c] sm:$0xf] }
  0xa1   :  { %1720 = vmatpush.bf16.msra.mxu1 %v2726_v18  ;;  %v2901_v18 = vld [vmem:[#allocation5 + $0x508] sm:$0xf]  ;;  %v2774_v29 = vor.u32 %v3413_v17, %v2773_v15  ;;  %v3493_v2 = vld [vmem:[#allocation5 + $0x694] sm:$0xf0] }
  0xa2   :  { %v3489_v15 = vld [vmem:[#allocation5 + $0x674] sm:$0xf0] }
  0xa3   :  { %1734 = vmatpush.bf16.msra.mxu2 %v2854_v19  ;;  %1748 = vmatpush.bf16.msra.mxu3 %v2982_v24  ;;  %v3445_v19 = vld [vmem:[#allocation5 + $0x514] sm:$0xf0]  ;;  %v2518_v24 = vor.u32 %v3349_v9, %v2517_v8  ;;  %v3363_v8 = vld [vmem:[#allocation5 + $0x28c] sm:$0xf]  ;;  %v2583_v9 = vld [vmem:[#allocation5 + $0x298] sm:$0xf0] }
  0xa4   :  { %1707 = vmatpush.bf16.msra.mxu0 %v2582_v30  ;;  %v3375_v30 = vld [vmem:[#allocation5 + $0x2ec] sm:$0xf]  ;;  %v2586_v17 = vor.u32 %v3363_v8, %v2583_v9 }
  0xa5   :  { %1721 = vmatpush.bf16.msra.mxu1 %v2710_v31  ;;  %v2631_v31 = vld [vmem:[#allocation5 + $0x2f8] sm:$0xf0] }
  0xa6   :  { %v2634_v40 = vor.u32 %v3375_v30, %v2631_v31  ;;  %v2570_v30 = vor.u32 %v3359_v21, %v2567_v22  ;;  %v2295_v31 = vld [vmem:[#allocation5 + $0x58] sm:$0xf0]  ;;  %v3467_v22 = vld [vmem:[#allocation5 + $0x5cc] sm:$0xf] }
  0xa7   :  { %1735 = vmatpush.bf16.msra.mxu2 %v2838_v32  ;;  %1749 = vmatpush.bf16.msra.mxu3 %v2966_v36  ;;  %v2902_v32 = vor.u32 %v3445_v19, %v2901_v18  ;;  %v3125_v36 = vld [vmem:[#allocation5 + $0x6c8] sm:$0xf]  ;;  %v2311_v18 = vld [vmem:[#allocation5 + $0x78] sm:$0xf0]  ;;  %v3327_v19 = vld [vmem:[#allocation5 + $0x16c] sm:$0xf] }
  0xa8   :  { %1708 = vmatpush.bf16.msra.mxu0 %v2566_v45  ;;  %v2487_v45 = vld [vmem:[#allocation5 + $0x1d8] sm:$0xf0]  ;;  %v3126_v48 = vor.u32 %v3501_v38, %v3125_v36  ;;  %v2442_v26 = vor.u32 %v3327_v19, %v2439_v20  ;;  %v3435_v19 = vld [vmem:[#allocation5 + $0x4cc] sm:$0xf] }
  0xa9   :  { %1722 = vmatpush.bf16.msra.mxu1 %v2694_v46  ;;  %v3371_v46 = vld [vmem:[#allocation5 + $0x2cc] sm:$0xf]  ;;  %v2490_v50 = vor.u32 %v3339_v44, %v2487_v45  ;;  %v2871_v21 = vld [vmem:[#allocation5 + $0x4d8] sm:$0xf0] }
  0xaa   :  { %v3287_v44 = vld [vmem:[#allocation5 + $0x2c] sm:$0xf] }
  0xab   :  { %1736 = vmatpush.bf16.msra.mxu2 %v2822_v47  ;;  %1750 = vmatpush.bf16.msra.mxu3 %v2950_v51  ;;  %v2615_v47 = vld [vmem:[#allocation5 + $0x2d8] sm:$0xf0]  ;;  %v3109_v51 = vld [vmem:[#allocation5 + $0x6a8] sm:$0xf] }
  0xac   :  { %1709 = vmatpush.bf16.msra.mxu0 %v2550_v58  ;;  %v2618_v54 = vor.u32 %v3371_v46, %v2615_v47  ;;  %v2471_v58 = vld [vmem:[#allocation5 + $0x1b8] sm:$0xf0]  ;;  %v3110_v61 = vor.u32 %v3497_v52, %v3109_v51  ;;  %v3319_v47 = vld [vmem:[#allocation5 + $0x12c] sm:$0xf]  ;;  %v3029_v52 = vld [vmem:[#allocation5 + $0x608] sm:$0xf] }
  0xad   :  { %1723 = vmatpush.bf16.msra.mxu1 %v2678_v59  ;;  %v3367_v59 = vld [vmem:[#allocation5 + $0x2ac] sm:$0xf]  ;;  %v2474_v63 = vor.u32 %v3335_v56, %v2471_v58  ;;  %v2279_v46 = vld [vmem:[#allocation5 + $0x38] sm:$0xf0] }
  0xae   :  { %v3283_v56 = vld [vmem:[#allocation5 + $0xc] sm:$0xf]  ;;  %v2263_v58 = vld [vmem:[#allocation5 + $0x18] sm:$0xf0] }
  0xaf   :  { %1737 = vmatpush.bf16.msra.mxu2 %v2806_v60  ;;  %1751 = vmatpush.bf16.msra.mxu3 %v2934_v1  ;;  %v2599_v60 = vld [vmem:[#allocation5 + $0x2b8] sm:$0xf0]  ;;  %v3093_v1 = vld [vmem:[#allocation5 + $0x688] sm:$0xf]  ;;  %v2266_v8 = vor.u32 %v3283_v56, %v2263_v58  ;;  %v3423_v56 = vld [vmem:[#allocation5 + $0x46c] sm:$0xf] }
  0xb0   :  { %1710 = vmatpush.bf16.msra.mxu0 %v2534_v7  ;;  %v2602_v4 = vor.u32 %v3367_v59, %v2599_v60  ;;  %v2455_v7 = vld [vmem:[#allocation5 + $0x198] sm:$0xf0]  ;;  %v3315_v59 = vld [vmem:[#allocation5 + $0x10c] sm:$0xf] }
  0xb1   :  { %1724 = vmatpush.bf16.msra.mxu1 %v2662_v10  ;;  %v3094_v10 = vor.u32 %v3493_v2, %v3093_v1  ;;  %v2458_v13 = vor.u32 %v3331_v6, %v2455_v7  ;;  %v3407_v1 = vld [vmem:[#allocation5 + $0x3ec] sm:$0xf]  ;;  %v2759_v2 = vld [vmem:[#allocation5 + $0x3f8] sm:$0xf0] }
  0xb2   :  { %v3471_v6 = vld [vmem:[#allocation5 + $0x5ec] sm:$0xf]  ;;  %v3015_v7 = vld [vmem:[#allocation5 + $0x5f8] sm:$0xf0] }
  0xb3   :  { %1738 = vmatpush.bf16.msra.mxu2 %v2790_v12  ;;  %1752 = vmatpush.bf16.msra.mxu3 %v2918_v16  ;;  %v2330_v12 = vor.u32 %v3299_v3, %v2327_v5  ;;  %v3295_v16 = vld [vmem:[#allocation5 + $0x6c] sm:$0xf]  ;;  %v2887_v5 = vld [vmem:[#allocation5 + $0x4f8] sm:$0xf0] }
  0xb4   :  { %1711 = vmatpush.bf16.msra.mxu0 %v2518_v24  ;;  %v3078_v24 = vor.u32 %v3489_v15, %v3077_v14  ;;  %v2314_v25 = vor.u32 %v3295_v16, %v2311_v18  ;;  %v3439_v3 = vld [vmem:[#allocation5 + $0x4ec] sm:$0xf]  ;;  %v2762_v14 = vor.u32 %v3407_v1, %v2759_v2  ;;  %v3018_v16 = vor.u32 %v3471_v6, %v3015_v7  ;;  %v2743_v18 = vld [vmem:[#allocation5 + $0x3d8] sm:$0xf0] }
  0xb5   :  { %1725 = vmatpush.bf16.msra.mxu1 %v2646_v28  ;;  %v3485_v28 = vld [vmem:[#allocation5 + $0x654] sm:$0xf0]  ;;  %v2890_v15 = vor.u32 %v3439_v3, %v2887_v5  ;;  %v3079_v1 = vld [vmem:[#allocation5 + $0x678] sm:$0xf0]  ;;  %v3775_v2 = vpop.f32.mrf.mxu1  ;;  %v3387_v6 = vld [vmem:[#allocation5 + $0x34c] sm:$0xf] }
  0xb6   :  { %v3062_v36 = vor.u32 %v3485_v28, %v3061_v27  ;;  %v2874_v28 = vor.u32 %v3435_v19, %v2871_v21  ;;  %v2679_v7 = vld [vmem:[#allocation5 + $0x358] sm:$0xf0]  ;;  %v3383_v19 = vld [vmem:[#allocation5 + $0x32c] sm:$0xf] }
  0xb7   :  { %1739 = vmatpush.bf16.msra.mxu2 %v2774_v29  ;;  %1753 = vmatpush.bf16.msra.mxu3 %v2902_v32  ;;  %v3291_v29 = vld [vmem:[#allocation5 + $0x4c] sm:$0xf] }
  0xb8   :  { %1760 = vmatpush.bf16.msrb.mxu0 %v3142_v33  ;;  %1726 = vmatmul.bf16.vlgmr.msra.gmra.mxu1 %v3744_v23  ;;  %v3323_v32 = vld [vmem:[#allocation5 + $0x14c] sm:$0xf]  ;;  %v2423_v33 = vld [vmem:[#allocation5 + $0x158] sm:$0xf0]  ;;  %v2298_v38 = vor.u32 %v3291_v29, %v2295_v31 }
  0xb9   :  { %1774 = vmatpush.bf16.msrb.mxu1 %v2378_v34  ;;  %1712 = vmatmul.bf16.vlgmr.msra.gmra.mxu0 %v3737_v0  ;;  %v3355_v34 = vld [vmem:[#allocation5 + $0x24c] sm:$0xf]  ;;  %v2426_v39 = vor.u32 %v3323_v32, %v2423_v33  ;;  %v2727_v31 = vld [vmem:[#allocation5 + $0x3b8] sm:$0xf0] }
  0xba   :  { %1740 = vmatmul.bf16.vlgmr.msra.gmra.mxu2 %v3747_v37  ;;  %1754 = vmatmul.bf16.vlgmr.msra.gmra.mxu3 %v3751_v42  ;;  %v3431_v32 = vld [vmem:[#allocation5 + $0x4ac] sm:$0xf] }
  0xbb   :  { %1788 = vmatpush.bf16.msrb.mxu2 %v2506_v35  ;;  %1802 = vmatpush.bf16.msrb.mxu3 %v2634_v40  ;;  %v2551_v35 = vld [vmem:[#allocation5 + $0x258] sm:$0xf0]  ;;  %v3045_v40 = vld [vmem:[#allocation5 + $0x628] sm:$0xf]  ;;  %v3415_v21 = vld [vmem:[#allocation5 + $0x42c] sm:$0xf] }
  0xbc   :  { %1761 = vmatpush.bf16.msrb.mxu0 %v3126_v48  ;;  %v2554_v45 = vor.u32 %v3355_v34, %v2551_v35  ;;  %v2407_v48 = vld [vmem:[#allocation5 + $0x138] sm:$0xf0]  ;;  %v3046_v51 = vor.u32 %v3481_v43, %v3045_v40  ;;  %v3463_v35 = vld [vmem:[#allocation5 + $0x5ac] sm:$0xf] }
  0xbd   :  { %1775 = vmatpush.bf16.msrb.mxu1 %v2362_v49  ;;  %v3351_v49 = vld [vmem:[#allocation5 + $0x22c] sm:$0xf]  ;;  %v2410_v55 = vor.u32 %v3319_v47, %v2407_v48  ;;  %v2855_v34 = vld [vmem:[#allocation5 + $0x4b8] sm:$0xf0] }
  0xbe   :  { %v2858_v43 = vor.u32 %v3431_v32, %v2855_v34  ;;  %v3427_v47 = vld [vmem:[#allocation5 + $0x48c] sm:$0xf] }
  0xbf   :  { %1789 = vmatpush.bf16.msrb.mxu2 %v2490_v50  ;;  %1803 = vmatpush.bf16.msrb.mxu3 %v2618_v54  ;;  %v2535_v50 = vld [vmem:[#allocation5 + $0x238] sm:$0xf0]  ;;  %v2282_v54 = vor.u32 %v3287_v44, %v2279_v46 }
  0xc0   :  { %1762 = vmatpush.bf16.msrb.mxu0 %v3110_v61  ;;  %v2538_v60 = vor.u32 %v3351_v49, %v2535_v50  ;;  %v2391_v61 = vld [vmem:[#allocation5 + $0x118] sm:$0xf0]  ;;  %v3459_v50 = vld [vmem:[#allocation5 + $0x58c] sm:$0xf] }
  0xc1   :  { %1776 = vmatpush.bf16.msrb.mxu1 %v2346_v62  ;;  %v3347_v62 = vld [vmem:[#allocation5 + $0x20c] sm:$0xf]  ;;  %v2394_v9 = vor.u32 %v3315_v59, %v2391_v61  ;;  %v2711_v46 = vld [vmem:[#allocation5 + $0x398] sm:$0xf0] }
  0xc2   :  { %v2839_v49 = vld [vmem:[#allocation5 + $0x498] sm:$0xf0] }
  0xc3   :  { %1790 = vmatpush.bf16.msrb.mxu2 %v2474_v63  ;;  %1804 = vmatpush.bf16.msrb.mxu3 %v2602_v4  ;;  %v2519_v63 = vld [vmem:[#allocation5 + $0x218] sm:$0xf0]  ;;  %v3030_v4 = vor.u32 %v3477_v53, %v3029_v52  ;;  %v2842_v53 = vor.u32 %v3427_v47, %v2839_v49  ;;  %v3475_v47 = vld [vmem:[#allocation5 + $0x60c] sm:$0xf] }
  0xc4   :  { %1763 = vmatpush.bf16.msrb.mxu0 %v3094_v10  ;;  %v3503_v10 = vld [vmem:[#allocation5 + $0x6ec] sm:$0xf]  ;;  %v3095_v52 = vld [vmem:[#allocation5 + $0x698] sm:$0xf0] }
  0xc5   :  { %1777 = vmatpush.bf16.msrb.mxu1 %v2330_v12  ;;  %v3143_v12 = vld [vmem:[#allocation5 + $0x6f8] sm:$0xf0] }
  0xc6   :  { %v3146_v20 = vor.u32 %v3503_v10, %v3143_v12  ;;  %v2823_v59 = vld [vmem:[#allocation5 + $0x478] sm:$0xf0]  ;;  %v3451_v12 = vld [vmem:[#allocation5 + $0x54c] sm:$0xf] }
  0xc7   :  { %1791 = vmatpush.bf16.msrb.mxu2 %v2458_v13  ;;  %1805 = vmatpush.bf16.msrb.mxu3 %v2586_v17  ;;  %v2522_v13 = vor.u32 %v3347_v62, %v2519_v63  ;;  %v3403_v17 = vld [vmem:[#allocation5 + $0x3cc] sm:$0xf]  ;;  %v2951_v61 = vld [vmem:[#allocation5 + $0x578] sm:$0xf0]  ;;  %v3773_v62 = vpop.f32.mrf.mxu0 }
  0xc8   :  { %1764 = vmatpush.bf16.msrb.mxu0 %v3078_v24  ;;  %v2999_v24 = vld [vmem:[#allocation5 + $0x5d8] sm:$0xf0]  ;;  %v2746_v27 = vor.u32 %v3403_v17, %v2743_v18  ;;  %v3487_v63 = vld [vmem:[#allocation5 + $0x66c] sm:$0xf] }
  0xc9   :  { %1778 = vmatpush.bf16.msrb.mxu1 %v2314_v25  ;;  %v3499_v25 = vld [vmem:[#allocation5 + $0x6cc] sm:$0xf]  ;;  %v3002_v29 = vor.u32 %v3467_v22, %v2999_v24  ;;  %v2807_v10 = vld [vmem:[#allocation5 + $0x458] sm:$0xf0]  ;;  %v3777_v22 = vpop.f32.mrf.mxu2 }
  0xcb   :  { %1792 = vmatpush.bf16.msrb.mxu2 %v2442_v26  ;;  %1806 = vmatpush.bf16.msrb.mxu3 %v2570_v30  ;;  %v3127_v26 = vld [vmem:[#allocation5 + $0x6d8] sm:$0xf0]  ;;  %v3399_v30 = vld [vmem:[#allocation5 + $0x3ac] sm:$0xf] }
  0xcc   :  { %1765 = vmatpush.bf16.msrb.mxu0 %v3062_v36  ;;  %v3130_v33 = vor.u32 %v3499_v25, %v3127_v26  ;;  %v2983_v36 = vld [vmem:[#allocation5 + $0x5b8] sm:$0xf0]  ;;  %v2730_v40 = vor.u32 %v3399_v30, %v2727_v31  ;;  %v3447_v26 = vld [vmem:[#allocation5 + $0x52c] sm:$0xf]  ;;  %v3779_v30 = vld [vmem:[#allocation7] sm:$0xf] }
  0xcd   :  { %1779 = vmatpush.bf16.msrb.mxu1 %v2298_v38  ;;  %v3495_v38 = vld [vmem:[#allocation5 + $0x6ac] sm:$0xf]  ;;  %v2986_v44 = vor.u32 %v3463_v35, %v2983_v36  ;;  %v2791_v25 = vld [vmem:[#allocation5 + $0x438] sm:$0xf0] }
  0xce   :  { %v3379_v35 = vld [vmem:[#allocation5 + $0x30c] sm:$0xf]  ;;  %v2647_v36 = vld [vmem:[#allocation5 + $0x318] sm:$0xf0] }
  0xcf   :  { %1793 = vmatpush.bf16.msrb.mxu2 %v2426_v39  ;;  %1807 = vmatpush.bf16.msrb.mxu3 %v2554_v45  ;;  %v3111_v39 = vld [vmem:[#allocation5 + $0x6b8] sm:$0xf0]  ;;  %v3395_v45 = vld [vmem:[#allocation5 + $0x38c] sm:$0xf]  ;;  %v1491_v32 = vpop.f32.mrf.mxu0  ;;  %v2650_v49 = vor.u32 %v3379_v35, %v2647_v36 }
  0xd0   :  { %1766 = vmatpush.bf16.msrb.mxu0 %v3046_v51  ;;  %v3114_v48 = vor.u32 %v3495_v38, %v3111_v39  ;;  %v3491_v51 = vld [vmem:[#allocation5 + $0x68c] sm:$0xf]  ;;  %v1505_v39 = vpop.f32.mrf.mxu1 }
  0xd1   :  { %1780 = vmatpush.bf16.msrb.mxu1 %v2282_v54  ;;  %v3391_v54 = vld [vmem:[#allocation5 + $0x36c] sm:$0xf]  ;;  %v3098_v58 = vor.u32 %v3491_v51, %v3095_v52 }
  0xd2   :  { %v3411_v38 = vld [vmem:[#allocation5 + $0x40c] sm:$0xf] }
  0xd3   :  { %1794 = vmatpush.bf16.msrb.mxu2 %v2410_v55  ;;  %1808 = vmatpush.bf16.msrb.mxu3 %v2538_v60  ;;  %v2695_v55 = vld [vmem:[#allocation5 + $0x378] sm:$0xf0]  ;;  %v3455_v60 = vld [vmem:[#allocation5 + $0x56c] sm:$0xf] }
  0xd4   :  { %1767 = vmatpush.bf16.msrb.mxu0 %v3030_v4  ;;  %v2698_v3 = vor.u32 %v3391_v54, %v2695_v55  ;;  %v2826_v4 = vor.u32 %v3423_v56, %v2823_v59  ;;  %v2954_v5 = vor.u32 %v3455_v60, %v2951_v61  ;;  %v3512_v56 = vld [vmem:[#allocation8 + $0x30] sm:$0xff] }
  0xd5   :  { %1781 = vmatpush.bf16.msrb.mxu1 %v2266_v8  ;;  %v3419_v8 = vld [vmem:[#allocation5 + $0x44c] sm:$0xf]  ;;  %v3520_v59 = vld [vmem:[#allocation8 + $0x70] sm:$0xff] }
  0xd6   :  { %v2810_v17 = vor.u32 %v3419_v8, %v2807_v10  ;;  %v3509_v10 = vld [vmem:[#allocation8 + $0x18] sm:$0xff] }
  0xd7   :  { %1795 = vmatpush.bf16.msrb.mxu2 %v2394_v9  ;;  %1809 = vmatpush.bf16.msrb.mxu3 %v2522_v13  ;;  %v3082_v9 = vor.u32 %v3487_v63, %v3079_v1  ;;  %v2935_v13 = vld [vmem:[#allocation5 + $0x558] sm:$0xf0]  ;;  %v3511_v1 = vld [vmem:[#allocation8 + $0x28] sm:$0xff] }
  0xd8   :  { %1816 = vmatpush.bf16.msra.mxu0 %v2762_v14  ;;  %1782 = vmatmul.bf16.vlgmr.msrb.gmra.mxu1 %v3735_v57  ;;  %v3483_v14 = vld [vmem:[#allocation5 + $0x64c] sm:$0xf]  ;;  %v2938_v18 = vor.u32 %v3451_v12, %v2935_v13  ;;  %v1559_v60 = vpop.f32.mrf.mxu1 }
  0xd9   :  { %1830 = vmatpush.bf16.msra.mxu1 %v2890_v15  ;;  %1768 = vmatmul.bf16.vlgmr.msrb.gmra.mxu0 %v3749_v41  ;;  %v3063_v15 = vld [vmem:[#allocation5 + $0x658] sm:$0xf0] }
  0xda   :  { %1796 = vmatmul.bf16.vlgmr.msrb.gmra.mxu2 %v3741_v11  ;;  %1810 = vmatmul.bf16.vlgmr.msrb.gmra.mxu3 %v3737_v0  ;;  %v2967_v11 = vld [vmem:[#allocation5 + $0x598] sm:$0xf0]  ;;  %v2714_v0 = vor.u32 %v3395_v45, %v2711_v46  ;;  %v3066_v24 = vor.u32 %v3483_v14, %v3063_v15  ;;  %v1531_v46 = vpop.f32.mrf.mxu3  ;;  %v3508_v14 = vld [vmem:[#allocation8 + $0x10] sm:$0xff] }
  0xdb   :  { %1844 = vmatpush.bf16.msra.mxu2 %v3018_v16  ;;  %1858 = vmatpush.bf16.msra.mxu3 %v3146_v20  ;;  %v2970_v57 = vor.u32 %v3459_v50, %v2967_v11  ;;  %v2682_v16 = vor.u32 %v3387_v6, %v2679_v7  ;;  %v2663_v20 = vld [vmem:[#allocation5 + $0x338] sm:$0xf0]  ;;  %v316_v50 = vperm.slane %v3779_v30, 0  ;;  %v3510_v6 = vld [vmem:[#allocation8 + $0x20] sm:$0xff]  ;;  %v3516_v15 = vld [vmem:[#allocation8 + $0x50] sm:$0xff] }
  0xdc   :  { %1817 = vmatpush.bf16.msra.mxu0 %v2746_v27  ;;  %v2919_v27 = vld [vmem:[#allocation5 + $0x538] sm:$0xf0]  ;;  %v2666_v31 = vor.u32 %v3383_v19, %v2663_v20  ;;  %v317_v20 = vperm.slane %v3779_v30, 1 }
  0xdd   :  { %1831 = vmatpush.bf16.msra.mxu1 %v2874_v28  ;;  %v3479_v28 = vld [vmem:[#allocation5 + $0x62c] sm:$0xf]  ;;  %v2922_v34 = vor.u32 %v3447_v26, %v2919_v27  ;;  %v2903_v45 = vld [vmem:[#allocation5 + $0x518] sm:$0xf0]  ;;  %v1490_v54 = vadd.f32 %v3773_v62, %v316_v50  ;;  %v1492_v55 = vadd.f32 %v1491_v32, %v316_v50  ;;  %v3514_v32 = vld [vmem:[#allocation8 + $0x40] sm:$0xff] }
  0xde   :  { %v3515_v26 = vld [vmem:[#allocation8 + $0x48] sm:$0xff] }
  0xdf   :  { %1845 = vmatpush.bf16.msra.mxu2 %v3002_v29  ;;  %1859 = vmatpush.bf16.msra.mxu3 %v3130_v33  ;;  %v3047_v29 = vld [vmem:[#allocation5 + $0x638] sm:$0xf0]  ;;  %v2794_v33 = vor.u32 %v3415_v21, %v2791_v25  ;;  %v1504_v61 = vadd.f32 %v3775_v2, %v1490_v54  ;;  %v1506_v63 = vadd.f32 %v1505_v39, %v1492_v55 }
  0xe0   :  { %1818 = vmatpush.bf16.msra.mxu0 %v2730_v40  ;;  %v3050_v40 = vor.u32 %v3479_v28, %v3047_v29  ;;  %v3506_v29 = vld [vmem:[#allocation8] sm:$0xff] }
  0xe1   :  { %1832 = vmatpush.bf16.msra.mxu1 %v2858_v43  ;;  %v2775_v43 = vld [vmem:[#allocation5 + $0x418] sm:$0xf0] }
  0xe2   :  { %v2778_v11 = vor.u32 %v3411_v38, %v2775_v43  ;;  %v1533_v62 = vpop.f32.mrf.mxu3 }
  0xe3   :  { %1846 = vmatpush.bf16.msra.mxu2 %v2986_v44  ;;  %1860 = vmatpush.bf16.msra.mxu3 %v3114_v48  ;;  %v3443_v44 = vld [vmem:[#allocation5 + $0x50c] sm:$0xf]  ;;  %v3031_v48 = vld [vmem:[#allocation5 + $0x618] sm:$0xf0] }
  0xe4   :  { %1819 = vmatpush.bf16.msra.mxu0 %v2714_v0  ;;  %v2906_v51 = vor.u32 %v3443_v44, %v2903_v45  ;;  %v3034_v52 = vor.u32 %v3475_v47, %v3031_v48  ;;  %v3513_v0 = vld [vmem:[#allocation8 + $0x38] sm:$0xff] }
  0xe5   :  { %1833 = vmatpush.bf16.msra.mxu1 %v2842_v53  ;;  %v3521_v53 = vld [vmem:[#allocation8 + $0x78] sm:$0xff] }
  0xe7   :  { %1847 = vmatpush.bf16.msra.mxu2 %v2970_v57  ;;  %1861 = vmatpush.bf16.msra.mxu3 %v3098_v58  ;;  %v1519_v57 = vpop.f32.mrf.mxu2  ;;  %v1545_v58 = vpop.f32.mrf.mxu0 }
  0xe8   :  { %1820 = vmatpush.bf16.msra.mxu0 %v2698_v3  ;;  %v3519_v3 = vld [vmem:[#allocation8 + $0x68] sm:$0xff] }
  0xe9   :  { %1834 = vmatpush.bf16.msra.mxu1 %v2826_v4  ;;  %v1518_v4 = vadd.f32 %v3777_v22, %v1504_v61  ;;  %v3507_v22 = vld [vmem:[#allocation8 + $0x8] sm:$0xff] }
  0xea   :  { %v1587_v2 = vpop.f32.mrf.mxu3 }
  0xeb   :  { %1848 = vmatpush.bf16.msra.mxu2 %v2954_v5  ;;  %1862 = vmatpush.bf16.msra.mxu3 %v3082_v9  ;;  %v1532_v7 = vadd.f32 %v1531_v46, %v1518_v4  ;;  %v1561_v9 = vpop.f32.mrf.mxu1  ;;  %v1588_v28 = vadd.f32 %v1587_v2, %v317_v20  ;;  %v3525_v4 = vld [vmem:[#allocation8 + $0x98] sm:$0xff] }
  0xec   :  { %1821 = vmatpush.bf16.msra.mxu0 %v2682_v16 }
  0xed   :  { %1835 = vmatpush.bf16.msra.mxu1 %v2810_v17  ;;  %v1546_v12 = vadd.f32 %v1545_v58, %v1532_v7  ;;  %v3529_v58 = vld [vmem:[#allocation8 + $0xb8] sm:$0xff] }
  0xef   :  { %1849 = vmatpush.bf16.msra.mxu2 %v2938_v18  ;;  %1863 = vmatpush.bf16.msra.mxu3 %v3066_v24  ;;  %v1573_v5 = vpop.f32.mrf.mxu2  ;;  %v1547_v8 = vpop.f32.mrf.mxu0  ;;  %v1560_v17 = vadd.f32 %v1559_v60, %v1546_v12 }
  0xf0   :  { %1822 = vmatpush.bf16.msra.mxu0 %v2666_v31 }
  0xf1   :  { %1836 = vmatpush.bf16.msra.mxu1 %v2794_v33  ;;  %v1574_v27 = vadd.f32 %v1573_v5, %v1560_v17  ;;  %v3524_v5 = vld [vmem:[#allocation8 + $0x90] sm:$0xff] }
  0xf2   :  { %v1589_v25 = vpop.f32.mrf.mxu3 }
  0xf3   :  { %1850 = vmatpush.bf16.msra.mxu2 %v2922_v34  ;;  %1864 = vmatpush.bf16.msra.mxu3 %v3050_v40  ;;  %v1872_v33 = vmax.f32 %v1574_v27, 0.0  ;;  %v1590_v39 = vadd.f32 %v1589_v25, %v317_v20 }
  0xf4   :  { %1823 = vmatpush.bf16.msra.mxu0 %v2650_v49 }
  0xf5   :  { %1837 = vmatpush.bf16.msra.mxu1 %v2778_v11  ;;  %v1615_v21 = vpop.f32.mrf.mxu1 }
  0xf7   :  { %1851 = vmatpush.bf16.msra.mxu2 %v2906_v51  ;;  %1865 = vmatpush.bf16.msra.mxu3 %v3034_v52  ;;  %v1575_v16 = vpop.f32.mrf.mxu2  ;;  %v1601_v19 = vpop.f32.mrf.mxu0 }
  0xf8   :  { %2144 = vmatpush.bf16.msrb.mxu0 %v3513_v0  ;;  %1838 = vmatmul.bf16.vlgmr.msra.gmra.mxu1 %v3747_v37  ;;  %v3518_v37 = vld [vmem:[#allocation8 + $0x60] sm:$0xff]  ;;  %v1602_v35 = vadd.f32 %v1601_v19, %v1588_v28 }
  0xf9   :  { %1824 = vmatmul.bf16.vlgmr.msra.gmra.mxu0 %v3744_v23  ;;  %2158 = vmatpush.bf16.msrb.mxu1 %v3521_v53  ;;  %v1520_v23 = vadd.f32 %v1519_v57, %v1506_v63  ;;  %v3534_v28 = vld [vmem:[#allocation8 + $0xe0] sm:$0xff] }
  0xfa   :  { %1852 = vmatmul.bf16.vlgmr.msra.gmra.mxu2 %v3751_v42  ;;  %1866 = vmatmul.bf16.vlgmr.msra.gmra.mxu3 %v3749_v41  ;;  %v3517_v41 = vld [vmem:[#allocation8 + $0x58] sm:$0xff]  ;;  %v1616_v44 = vadd.f32 %v1615_v21, %v1602_v35 }
  0xfb   :  { %v1534_v42 = vadd.f32 %v1533_v62, %v1520_v23  ;;  %2172 = vmatpush.bf16.msrb.mxu2 %v3529_v58  ;;  %v3528_v62 = vld [vmem:[#allocation8 + $0xb0] sm:$0xff]  ;;  %v3533_v35 = vld [vmem:[#allocation8 + $0xd8] sm:$0xff] }
  0xfc   :  { %2145 = vmatpush.bf16.msrb.mxu0 %v3512_v56 }
  0xfd   :  { %2159 = vmatpush.bf16.msrb.mxu1 %v3520_v59  ;;  %v1548_v13 = vadd.f32 %v1547_v8, %v1534_v42  ;;  %v1617_v40 = vpop.f32.mrf.mxu1  ;;  %v1643_v43 = vpop.f32.mrf.mxu3  ;;  %v3522_v42 = vld [vmem:[#allocation8 + $0x80] sm:$0xff]  ;;  %v318_v8 = vperm.slane %v3779_v30, 2 }
  0xff   :  { %v1562_v18 = vadd.f32 %v1561_v9, %v1548_v13  ;;  %v1629_v34 = vpop.f32.mrf.mxu2  ;;  %v1603_v38 = vpop.f32.mrf.mxu0  ;;  %2173 = vmatpush.bf16.msrb.mxu2 %v3528_v62  ;;  %v3536_v13 = vld [vmem:[#allocation8 + $0xf0] sm:$0xff] }
 0x100   :  { %2146 = vmatpush.bf16.msrb.mxu0 %v3511_v1  ;;  %v1604_v45 = vadd.f32 %v1603_v38, %v1590_v39  ;;  %v1630_v46 = vadd.f32 %v1629_v34, %v1616_v44  ;;  %v3527_v1 = vld [vmem:[#allocation8 + $0xa8] sm:$0xff] }
 0x101   :  { %2160 = vmatpush.bf16.msrb.mxu1 %v3519_v3  ;;  %v1576_v24 = vadd.f32 %v1575_v16, %v1562_v18  ;;  %v3526_v3 = vld [vmem:[#allocation8 + $0xa0] sm:$0xff] }
 0x102   :  { %v1618_v49 = vadd.f32 %v1617_v40, %v1604_v45  ;;  %v1644_v11 = vadd.f32 %v1643_v43, %v1630_v46  ;;  %v3532_v43 = vld [vmem:[#allocation8 + $0xd0] sm:$0xff] }
 0x103   :  { %v1876_v31 = vmax.f32 %v1576_v24, 0.0  ;;  %2174 = vmatpush.bf16.msrb.mxu2 %v3527_v1  ;;  %v3535_v24 = vld [vmem:[#allocation8 + $0xe8] sm:$0xff] }
 0x104   :  { %2147 = vmatpush.bf16.msrb.mxu0 %v3510_v6 }
 0x105   :  { %2161 = vmatpush.bf16.msrb.mxu1 %v3518_v37  ;;  %v1880_v36 = vpack.c.bf16 %v1876_v31, %v1872_v33  ;;  %v1645_v52 = vpop.f32.mrf.mxu3  ;;  %v3523_v37 = vld [vmem:[#allocation8 + $0x88] sm:$0xff] }
 0x107   :  { %v1631_v47 = vpop.f32.mrf.mxu2  ;;  %2175 = vmatpush.bf16.msrb.mxu2 %v3526_v3 }
 0x108   :  { %2148 = vmatpush.bf16.msrb.mxu0 %v3509_v10  ;;  %v1632_v51 = vadd.f32 %v1631_v47, %v1618_v49  ;;  %v3531_v47 = vld [vmem:[#allocation8 + $0xc8] sm:$0xff]  ;;  %v3530_v49 = vld [vmem:[#allocation8 + $0xc0] sm:$0xff] }
 0x109   :  { %2162 = vmatpush.bf16.msrb.mxu1 %v3517_v41  ;;  %v3537_v41 = vld [vmem:[#allocation8 + $0xf8] sm:$0xff] }
 0x10a   :  { %v1646_v53 = vadd.f32 %v1645_v52, %v1632_v51  ;;  %2186 = vmatpush.bf16.msrb.mxu3 %v3537_v41  ;;  %v319_v51 = vperm.slane %v3779_v30, 3 }
 0x10b   :  { %2176 = vmatpush.bf16.msrb.mxu2 %v3525_v4 }
 0x10c   :  { %2149 = vmatpush.bf16.msrb.mxu0 %v3508_v14 }
 0x10d   :  { %2163 = vmatpush.bf16.msrb.mxu1 %v3516_v15 }
 0x10e   :  { %2187 = vmatpush.bf16.msrb.mxu3 %v3536_v13  ;;  %v3551_v13 = vld [vmem:[%s3802_s4] ss:$0 sm:$0xff]  ;;  %s3691_s4 = smov 128  }
 0x10f   :  { %2177 = vmatpush.bf16.msrb.mxu2 %v3524_v5 }
 0x110   :  { %2150 = vmatpush.bf16.msrb.mxu0 %v3507_v22 }
 0x111   :  { %2164 = vmatpush.bf16.msrb.mxu1 %v3515_v26 }
 0x112   :  { %2188 = vmatpush.bf16.msrb.mxu3 %v3535_v24 }
 0x113   :  { %2178 = vmatpush.bf16.msrb.mxu2 %v3523_v37 }
 0x114   :  { %2151 = vmatpush.bf16.msrb.mxu0 %v3506_v29 }
 0x115   :  { %2165 = vmatpush.bf16.msrb.mxu1 %v3514_v32  ;;  %v1671_v50 = vpop.f32.mrf.mxu1 }
 0x116   :  { %v1657_v48 = vpop.f32.mrf.mxu0  ;;  %2189 = vmatpush.bf16.msrb.mxu3 %v3534_v28 }
 0x117   :  { %2152 = vmatmul.bf16.vlgmr.msrb.gmra.mxu0 %v1880_v36  ;;  %v1658_v0 = vadd.f32 %v1657_v48, %v1644_v11  ;;  %2179 = vmatpush.bf16.msrb.mxu2 %v3522_v42 }
 0x119   :  { %v1672_v54 = vadd.f32 %v1671_v50, %v1658_v0 }
 0x11a   :  { %2190 = vmatpush.bf16.msrb.mxu3 %v3533_v35 }
 0x11b   :  { %v1873_v60 = vmax.f32 %v1672_v54, 0.0 }
 0x11d   :  { %v1673_v56 = vpop.f32.mrf.mxu1  ;;  %v1685_v23 = vpop.f32.mrf.mxu2 }
 0x11e   :  { %v1659_v57 = vpop.f32.mrf.mxu0  ;;  %v1699_v6 = vpop.f32.mrf.mxu3  ;;  %v1686_v10 = vadd.f32 %v1685_v23, %v318_v8  ;;  %2191 = vmatpush.bf16.msrb.mxu3 %v3532_v43 }
 0x11f   :  { %v1660_v55 = vadd.f32 %v1659_v57, %v1646_v53 }
 0x120   :  { %v1700_v14 = vadd.f32 %v1699_v6, %v1686_v10 }
 0x121   :  { %v1674_v59 = vadd.f32 %v1673_v56, %v1660_v55 }
 0x122   :  { %2192 = vmatpush.bf16.msrb.mxu3 %v3531_v47 }
 0x123   :  { %v1877_v61 = vmax.f32 %v1674_v59, 0.0 }
 0x125   :  { %v1881_v63 = vpack.c.bf16 %v1877_v61, %v1873_v60  ;;  %v1687_v7 = vpop.f32.mrf.mxu2 }
 0x126   :  { %v1701_v9 = vpop.f32.mrf.mxu3  ;;  %v1688_v15 = vadd.f32 %v1687_v7, %v318_v8  ;;  %2193 = vmatpush.bf16.msrb.mxu3 %v3530_v49 }
 0x127   :  { %2166 = vmatmul.bf16.vlgmr.msrb.gmra.mxu1 %v1881_v63 }
 0x128   :  { %v1702_v18 = vadd.f32 %v1701_v9, %v1688_v15 }
 0x135   :  { %v1727_v12 = vpop.f32.mrf.mxu1 }
 0x136   :  { %v1713_v2 = vpop.f32.mrf.mxu0 }
 0x137   :  { %v1714_v19 = vadd.f32 %v1713_v2, %v1700_v14 }
 0x139   :  { %v1728_v21 = vadd.f32 %v1727_v12, %v1714_v19 }
 0x13d   :  { %v1741_v16 = vpop.f32.mrf.mxu2  ;;  %v1755_v20 = vpop.f32.mrf.mxu3 }
 0x13e   :  { %v1715_v17 = vpop.f32.mrf.mxu0  ;;  %v1729_v25 = vpop.f32.mrf.mxu1  ;;  %v1742_v29 = vadd.f32 %v1741_v16, %v1728_v21 }
 0x13f   :  { %v1716_v22 = vadd.f32 %v1715_v17, %v1702_v18 }
 0x140   :  { %v1756_v34 = vadd.f32 %v1755_v20, %v1742_v29 }
 0x141   :  { %v1730_v31 = vadd.f32 %v1729_v25, %v1716_v22 }
 0x145   :  { %v1743_v26 = vpop.f32.mrf.mxu2  ;;  %v1757_v33 = vpop.f32.mrf.mxu3 }
 0x146   :  { %v1744_v32 = vadd.f32 %v1743_v26, %v1730_v31 }
 0x148   :  { %v1758_v36 = vadd.f32 %v1757_v33, %v1744_v32 }
 0x155   :  { %v1783_v48 = vpop.f32.mrf.mxu1 }
 0x156   :  { %v1769_v27 = vpop.f32.mrf.mxu0  ;;  %v1784_v0 = vadd.f32 %v1783_v48, %v319_v51 }
 0x157   :  { %v1770_v38 = vadd.f32 %v1769_v27, %v1756_v34 }
 0x159   :  { %v1874_v44 = vmax.f32 %v1770_v38, 0.0 }
 0x15d   :  { %v1797_v50 = vpop.f32.mrf.mxu2  ;;  %v1811_v11 = vpop.f32.mrf.mxu3 }
 0x15e   :  { %v1771_v39 = vpop.f32.mrf.mxu0  ;;  %v1785_v52 = vpop.f32.mrf.mxu1  ;;  %v1798_v57 = vadd.f32 %v1797_v50, %v1784_v0 }
 0x15f   :  { %v1772_v40 = vadd.f32 %v1771_v39, %v1758_v36  ;;  %v1786_v54 = vadd.f32 %v1785_v52, %v319_v51 }
 0x160   :  { %v1812_v59 = vadd.f32 %v1811_v11, %v1798_v57 }
 0x161   :  { %v1878_v45 = vmax.f32 %v1772_v40, 0.0 }
 0x163   :  { %v1882_v46 = vpack.c.bf16 %v1878_v45, %v1874_v44 }
 0x165   :  { %2180 = vmatmul.bf16.vlgmr.msrb.gmra.mxu2 %v1882_v46  ;;  %v1799_v53 = vpop.f32.mrf.mxu2  ;;  %v1813_v55 = vpop.f32.mrf.mxu3 }
 0x166   :  { %v1800_v60 = vadd.f32 %v1799_v53, %v1786_v54 }
 0x168   :  { %v1814_v62 = vadd.f32 %v1813_v55, %v1800_v60 }
 0x175   :  { %v1839_v58 = vpop.f32.mrf.mxu1 }
 0x176   :  { %v1825_v56 = vpop.f32.mrf.mxu0 }
 0x177   :  { %v1826_v61 = vadd.f32 %v1825_v56, %v1812_v59 }
 0x179   :  { %v1840_v4 = vadd.f32 %v1839_v58, %v1826_v61 }
 0x17d   :  { %v1853_v63 = vpop.f32.mrf.mxu2  ;;  %v1867_v1 = vpop.f32.mrf.mxu3 }
 0x17e   :  { %v1827_v3 = vpop.f32.mrf.mxu0  ;;  %v1854_v5 = vadd.f32 %v1853_v63, %v1840_v4  ;;  %v1841_v6 = vpop.f32.mrf.mxu1 }
 0x17f   :  { %v1828_v23 = vadd.f32 %v1827_v3, %v1814_v62 }
 0x180   :  { %v1868_v7 = vadd.f32 %v1867_v1, %v1854_v5 }
 0x181   :  { %v1842_v30 = vadd.f32 %v1841_v6, %v1828_v23 }
 0x182   :  { %v1875_v9 = vmax.f32 %v1868_v7, 0.0 }
 0x185   :  { %v1855_v37 = vpop.f32.mrf.mxu2  ;;  %v1869_v8 = vpop.f32.mrf.mxu3 }
 0x186   :  { %v1856_v42 = vadd.f32 %v1855_v37, %v1842_v30 }
 0x188   :  { %v1870_v2 = vadd.f32 %v1869_v8, %v1856_v42 }
 0x18a   :  { %v1879_v10 = vmax.f32 %v1870_v2, 0.0 }
 0x18c   :  { %v1883_v41 = vpack.c.bf16 %v1879_v10, %v1875_v9 }
 0x18e   :  { %2194 = vmatmul.bf16.vlgmr.msrb.gmra.mxu3 %v1883_v41 }
 0x194   :  { %v2153_v12 = vpop.f32.mrf.mxu0 }
 0x195   :  { %v2154_v16 = vadd.f32 %v3551_v13, %v2153_v12 }
 0x19c   :  { %v2155_v19 = vpop.f32.mrf.mxu0 }
 0x19d   :  { %v2156_v24 = vadd.f32 %v3551_v13, %v2155_v19 }
 0x1a4   :  { %v2167_v14 = vpop.f32.mrf.mxu1 }
 0x1a5   :  { %v2168_v17 = vadd.f32 %v2167_v14, %v2154_v16 }
 0x1ac   :  { %v2169_v22 = vpop.f32.mrf.mxu1 }
 0x1ad   :  { %v2170_v26 = vadd.f32 %v2169_v22, %v2156_v24 }
 0x1e8   :  { %v2181_v15 = vpop.f32.mrf.mxu2 }
 0x1e9   :  { %v2182_v18 = vadd.f32 %v2181_v15, %v2168_v17 }
 0x1f0   :  { %v2183_v25 = vpop.f32.mrf.mxu2 }
 0x1f1   :  { %v2184_v27 = vadd.f32 %v2183_v25, %v2170_v26 }
 0x211   :  { %v2195_v20 = vpop.f32.mrf.mxu3 }
 0x212   :  { %v2196_v21 = vadd.f32 %v2195_v20, %v2182_v18 }
 0x214   :  { %2200 = vst [vmem:[#allocation10] sm:$0xff] %v2196_v21 }
 0x219   :  { %v2197_v28 = vpop.f32.mrf.mxu3 }
 0x21a   :  { %v2198_v29 = vadd.f32 %v2197_v28, %v2184_v27 }
 0x21c   :  { %2201 = vst [vmem:[#allocation10 + $0x8] sm:$0xff] %v2198_v29 }
 0x21d   :  { %2214 = dma.vmem_to_hbm [thread:$0]  %s2207_s18, 256, %s2209_s21, [#allocation4], %s3691_s4, %s3691_s4, %s3692_s22  }
 0x21e   :  { %3678 = dma.done.wait [#allocation4], 256  }
 0x21f   :  { %3679 = vsyncadd [#allocation4], 4294967040 }
 0x220   :  { %2219 = vsyncpa [#allocation3], 1 }
 0x221   :  { %2220 = vsyncpa [#allocation6], 1 }
 0x222   :  { %2221 = vsyncpa [#allocation9], 1 }
 0x223   :  { %2222 = vsyncpa [#allocation4], 1 }

</bundles_post_ra>
